<compile_context>
chip_gen: v5e
topology: v5e:2x2
jax: 0.10.0
libtpu: 0.0.40
codegen_flags: <defaults>
</compile_context>

<pallas_src>
import jax
import jax.numpy as jnp
import numpy as np
from jax import lax
from jax.experimental import pallas as pl
from jax.experimental.pallas import tpu as pltpu

BN_EPS = 1e-5


def _round_up(a, b):
    return (a + b - 1) // b * b


def aux_head_kernel(x_ref, wp_ref, b1_ref, w2_ref, b2_ref, wc_ref, bc_ref,
                    out_ref):
    # x_ref: (TILE_N, 64*C) channels-last, fully lane-dense, native dtype.
    x = jnp.maximum(x_ref[...].astype(jnp.float32), 0.0)           # ReLU once
    # ReLU->AvgPool(5,3)->Conv1x1->BN1 folded into one (64*C, 4*mid) weight.
    y = jnp.dot(x, wp_ref[...], preferred_element_type=jnp.float32) + b1_ref[...]
    y = jnp.maximum(y, 0.0)                                        # (TILE_N, 4*mid)
    # Conv2x2 + BN2 as a single K = 4*mid MXU matmul over all 4 positions.
    z = jnp.dot(y, w2_ref[...], preferred_element_type=jnp.float32) + b2_ref[...]
    z = jnp.maximum(z, 0.0)                                        # (TILE_N, out_ch)
    # Classifier: lane-dense (padded to a multiple of 128 columns) output.
    out = jnp.dot(z, wc_ref[...], preferred_element_type=jnp.float32) + bc_ref[...]
    out_ref[...] = out.astype(out_ref.dtype)


def aux_head_forward(x_nchw, params):
    (w1, g1, be1, m1, v1, w2, g2, be2, m2, v2, wc, bc) = params
    n, c, h, w = x_nchw.shape
    assert (h, w) == (8, 8), "AuxiliaryHeadCIFAR assumes 8x8 spatial input"
    mid = w1.shape[0]        # 128
    out_ch = w2.shape[0]     # 768
    num_classes = wc.shape[0]

    # Fold BatchNorm (inference semantics) into per-channel scale/bias.
    s1 = (g1 / jnp.sqrt(v1 + BN_EPS)).astype(jnp.float32)
    b1 = (be1 - m1 * s1).astype(jnp.float32)
    s2 = (g2 / jnp.sqrt(v2 + BN_EPS)).astype(jnp.float32)
    b2 = (be2 - m2 * s2).astype(jnp.float32)

    # ---- Fold pooling + Conv1x1 + BN1 into one (64*C, 4*mid) matmul weight.
    # x is flattened channels-last: row index = hw*C + c; column = p*mid + o
    # where p = kh*2 + kw indexes the 2x2 pooled positions.
    w1_mat = (jnp.transpose(w1.reshape(mid, c)) * s1[None, :]) * (1.0 / 25.0)  # (C, mid)
    pool_mask = np.zeros((h * w, 4), np.float32)       # [hw, p] membership
    for p in range(4):
        kh, kw = p // 2, p % 2
        for dh in range(5):
            for dw in range(5):
                pool_mask[(kh * 3 + dh) * w + (kw * 3 + dw), p] = 1.0
    wp_k = (jnp.asarray(pool_mask)[:, None, :, None] *
            w1_mat[None, :, None, :]).reshape(h * w * c, 4 * mid).astype(jnp.float32)
    b1t = jnp.tile(b1.reshape(1, mid), (1, 4)).astype(jnp.float32)   # (1, 4*mid)

    # Conv2x2 + BN2: row index p*mid + i matches y's column layout.
    w2_k = (jnp.transpose(w2, (2, 3, 1, 0)).reshape(4 * mid, out_ch)
            * s2[None, :]).astype(jnp.float32)                       # (4*mid, out_ch)
    b2_k = b2.reshape(1, out_ch)

    # Lane-dense classifier: pad to a multiple of 128 output columns.
    out_cols = _round_up(max(num_classes, 1), 128)
    wc_k = jnp.zeros((out_ch, out_cols), jnp.float32).at[:, :num_classes].set(
        jnp.transpose(wc).astype(jnp.float32))
    bc_k = jnp.zeros((1, out_cols), jnp.float32).at[:, :num_classes].set(
        bc.reshape(1, -1).astype(jnp.float32))

    # Channels-last, (H*W*C) flattened onto lanes: (N, 64*C). Native dtype.
    x_flat = jnp.transpose(x_nchw, (0, 2, 3, 1)).reshape(n, h * w * c)

    # ---- Tile sizing with lane-padding-aware VMEM accounting ---------------
    k1 = h * w * c
    xb = x_flat.dtype.itemsize
    weight_bytes = 4 * (wp_k.size + b1t.size + w2_k.size + b2_k.size
                        + wc_k.size + bc_k.size)

    def vmem_bytes(rows):
        return (2 * rows * k1 * xb                     # x tile, double-buffered
                + 2 * rows * out_cols * 4              # out tile, double-buffered
                + 2 * weight_bytes                     # resident weights (x2: safe)
                + rows * 4 * (k1 + 4 * mid + out_ch + out_cols))  # f32 intermediates

    per_row = 2 * k1 * xb + 2 * out_cols * 4 + 4 * (k1 + 4 * mid + out_ch + out_cols)
    fixed = 2 * weight_bytes
    budget = 16 << 20                                  # fits v5e default scoped VMEM
    max_rows = max(8, ((budget - fixed) // per_row) // 8 * 8) if budget > fixed else 8

    n8 = _round_up(n, 8)
    # v7x: ensure the "parallel" axis has >=2 grid steps when the batch allows,
    # so both TensorCores get work (harmless on single-TC v5e/v6e).
    tc_cap = max(8, _round_up(pl.cdiv(n8, 2), 8))
    tile_n = max(8, min(1024, tc_cap, n8, max_rows))

    n_pad = _round_up(n, tile_n)
    if n_pad != n:
        x_flat = jnp.pad(x_flat, ((0, n_pad - n), (0, 0)))

    vmem_limit = int(min(vmem_bytes(tile_n) + (4 << 20), 48 << 20))

    cost = pl.CostEstimate(
        flops=2 * n_pad * (k1 * 4 * mid + 4 * mid * out_ch + out_ch * out_cols),
        transcendentals=0,
        bytes_accessed=int(x_flat.size * xb + weight_bytes + 4 * n_pad * out_cols),
    )

    out = pl.pallas_call(
        aux_head_kernel,
        out_shape=jax.ShapeDtypeStruct((n_pad, out_cols), jnp.float32),
        grid=(n_pad // tile_n,),
        in_specs=[
            pl.BlockSpec((tile_n, k1), lambda i: (i, 0)),           # x tiles over batch
            pl.BlockSpec((k1, 4 * mid), lambda i: (0, 0)),          # pool+conv1 weight
            pl.BlockSpec((1, 4 * mid), lambda i: (0, 0)),
            pl.BlockSpec((4 * mid, out_ch), lambda i: (0, 0)),      # conv2 weight
            pl.BlockSpec((1, out_ch), lambda i: (0, 0)),
            pl.BlockSpec((out_ch, out_cols), lambda i: (0, 0)),     # classifier
            pl.BlockSpec((1, out_cols), lambda i: (0, 0)),
        ],
        out_specs=pl.BlockSpec((tile_n, out_cols), lambda i: (i, 0)),
        compiler_params=pltpu.CompilerParams(
            dimension_semantics=("parallel",),
            vmem_limit_bytes=vmem_limit),
        cost_estimate=cost,
    )(x_flat, wp_k, b1t, w2_k, b2_k, wc_k, bc_k)

    return out[:n, :num_classes]


def reference_forward(x_nchw, params):
    """Pure-JAX reference mirroring the PyTorch module (eval-mode BN)."""
    (w1, g1, be1, m1, v1, w2, g2, be2, m2, v2, wc, bc) = params
    dn = ('NCHW', 'OIHW', 'NCHW')

    def bn(t, g, b, m, v):
        return ((t - m[None, :, None, None]) /
                jnp.sqrt(v[None, :, None, None] + BN_EPS)
                * g[None, :, None, None] + b[None, :, None, None])

    x = jnp.maximum(x_nchw, 0.0)
    x = lax.reduce_window(x, 0.0, lax.add, (1, 1, 5, 5), (1, 1, 3, 3), 'VALID') / 25.0
    y = lax.conv_general_dilated(x, w1, (1, 1), 'VALID', dimension_numbers=dn)
    y = jnp.maximum(bn(y, g1, be1, m1, v1), 0.0)
    z = lax.conv_general_dilated(y, w2, (1, 1), 'VALID', dimension_numbers=dn)
    z = jnp.maximum(bn(z, g2, be2, m2, v2), 0.0)
    z = z.reshape(z.shape[0], -1)
    return z @ wc.T + bc


if __name__ == "__main__":
    key = jax.random.PRNGKey(0)
    N, C, num_classes = 2, 4, 10
    ks = jax.random.split(key, 13)

    x = jax.random.normal(ks[0], (N, C, 8, 8), jnp.float32)

    w1 = 0.10 * jax.random.normal(ks[1], (128, C, 1, 1), jnp.float32)
    g1 = 1.0 + 0.1 * jax.random.normal(ks[2], (128,), jnp.float32)
    be1 = 0.1 * jax.random.normal(ks[3], (128,), jnp.float32)
    m1 = 0.1 * jax.random.normal(ks[4], (128,), jnp.float32)
    v1 = jax.random.uniform(ks[5], (128,), jnp.float32, 0.5, 1.5)

    w2 = 0.05 * jax.random.normal(ks[6], (768, 128, 2, 2), jnp.float32)
    g2 = 1.0 + 0.1 * jax.random.normal(ks[7], (768,), jnp.float32)
    be2 = 0.1 * jax.random.normal(ks[8], (768,), jnp.float32)
    m2 = 0.1 * jax.random.normal(ks[9], (768,), jnp.float32)
    v2 = jax.random.uniform(ks[10], (768,), jnp.float32, 0.5, 1.5)

    wc = 0.03 * jax.random.normal(ks[11], (num_classes, 768), jnp.float32)
    bc = 0.1 * jax.random.normal(ks[12], (num_classes,), jnp.float32)

    params = (w1, g1, be1, m1, v1, w2, g2, be2, m2, v2, wc, bc)

    out = jax.block_until_ready(aux_head_forward(x, params))
    ref = jax.block_until_ready(reference_forward(x, params))

    assert out.shape == (N, num_classes)
    np.testing.assert_allclose(np.asarray(out), np.asarray(ref),
                               rtol=1e-4, atol=1e-4)
    print("KERNEL_OK")
</pallas_src>

<mosaic_0001>
module attributes {stable_mosaic.version = 11 : i64} {
  func.func @aux_head_kernel(%arg0: i32, %arg1: memref<8x256xf32, #tpu.memory_space<vmem>>, %arg2: memref<256x512xf32, #tpu.memory_space<vmem>>, %arg3: memref<1x512xf32, #tpu.memory_space<vmem>>, %arg4: memref<512x768xf32, #tpu.memory_space<vmem>>, %arg5: memref<1x768xf32, #tpu.memory_space<vmem>>, %arg6: memref<768x128xf32, #tpu.memory_space<vmem>>, %arg7: memref<1x128xf32, #tpu.memory_space<vmem>>, %arg8: memref<8x128xf32, #tpu.memory_space<vmem>>) attributes {dimension_semantics = [#tpu.dimension_semantics<parallel>], iteration_bounds = array<i64: 1>, scalar_prefetch = 0 : i64, scratch_operands = 0 : i64, tpu.core_type = #tpu.core_type<tc>, window_params = [{transform_indices = @transform_0, window_bounds = array<i64: 8, 256>}, {pipeline_mode = #tpu.pipeline_mode<synchronous>, transform_indices = @transform_1, window_bounds = array<i64: 256, 512>}, {pipeline_mode = #tpu.pipeline_mode<synchronous>, transform_indices = @transform_2, window_bounds = array<i64: 1, 512>}, {pipeline_mode = #tpu.pipeline_mode<synchronous>, transform_indices = @transform_3, window_bounds = array<i64: 512, 768>}, {pipeline_mode = #tpu.pipeline_mode<synchronous>, transform_indices = @transform_4, window_bounds = array<i64: 1, 768>}, {pipeline_mode = #tpu.pipeline_mode<synchronous>, transform_indices = @transform_5, window_bounds = array<i64: 768, 128>}, {pipeline_mode = #tpu.pipeline_mode<synchronous>, transform_indices = @transform_6, window_bounds = array<i64: 1, 128>}, {transform_indices = @transform_7, window_bounds = array<i64: 8, 128>}]} {
    %c0 = arith.constant 0 : index
    %c0_0 = arith.constant 0 : index
    %0 = vector.load %arg1[%c0, %c0_0] : memref<8x256xf32, #tpu.memory_space<vmem>>, vector<8x256xf32>
    %cst = arith.constant 0.000000e+00 : f32
    %1 = vector.broadcast %cst : f32 to vector<8x256xf32>
    %2 = arith.maximumf %0, %1 : vector<8x256xf32>
    %c0_1 = arith.constant 0 : index
    %c0_2 = arith.constant 0 : index
    %3 = vector.load %arg2[%c0_1, %c0_2] : memref<256x512xf32, #tpu.memory_space<vmem>>, vector<256x512xf32>
    %cst_3 = arith.constant dense<0.000000e+00> : vector<8x512xf32>
    %4 = tpu.matmul %2, %3, %cst_3 {dimension_numbers = #tpu.dot_dimension_numbers<[1], [0], [0], [1], [0, 0, 1, 1], [], []>} : vector<8x256xf32>, vector<256x512xf32>, vector<8x512xf32> -> vector<8x512xf32>
    %c0_4 = arith.constant 0 : index
    %c0_5 = arith.constant 0 : index
    %5 = vector.load %arg3[%c0_4, %c0_5] : memref<1x512xf32, #tpu.memory_space<vmem>>, vector<1x512xf32>
    %6 = vector.broadcast %5 : vector<1x512xf32> to vector<8x512xf32>
    %7 = arith.addf %4, %6 : vector<8x512xf32>
    %cst_6 = arith.constant 0.000000e+00 : f32
    %8 = vector.broadcast %cst_6 : f32 to vector<8x512xf32>
    %9 = arith.maximumf %7, %8 : vector<8x512xf32>
    %c0_7 = arith.constant 0 : index
    %c0_8 = arith.constant 0 : index
    %10 = vector.load %arg4[%c0_7, %c0_8] : memref<512x768xf32, #tpu.memory_space<vmem>>, vector<512x768xf32>
    %cst_9 = arith.constant dense<0.000000e+00> : vector<8x768xf32>
    %11 = tpu.matmul %9, %10, %cst_9 {dimension_numbers = #tpu.dot_dimension_numbers<[1], [0], [0], [1], [0, 0, 1, 1], [], []>} : vector<8x512xf32>, vector<512x768xf32>, vector<8x768xf32> -> vector<8x768xf32>
    %c0_10 = arith.constant 0 : index
    %c0_11 = arith.constant 0 : index
    %12 = vector.load %arg5[%c0_10, %c0_11] : memref<1x768xf32, #tpu.memory_space<vmem>>, vector<1x768xf32>
    %13 = vector.broadcast %12 : vector<1x768xf32> to vector<8x768xf32>
    %14 = arith.addf %11, %13 : vector<8x768xf32>
    %cst_12 = arith.constant 0.000000e+00 : f32
    %15 = vector.broadcast %cst_12 : f32 to vector<8x768xf32>
    %16 = arith.maximumf %14, %15 : vector<8x768xf32>
    %c0_13 = arith.constant 0 : index
    %c0_14 = arith.constant 0 : index
    %17 = vector.load %arg6[%c0_13, %c0_14] : memref<768x128xf32, #tpu.memory_space<vmem>>, vector<768x128xf32>
    %cst_15 = arith.constant dense<0.000000e+00> : vector<8x128xf32>
    %18 = tpu.matmul %16, %17, %cst_15 {dimension_numbers = #tpu.dot_dimension_numbers<[1], [0], [0], [1], [0, 0, 1, 1], [], []>} : vector<8x768xf32>, vector<768x128xf32>, vector<8x128xf32> -> vector<8x128xf32>
    %c0_16 = arith.constant 0 : index
    %c0_17 = arith.constant 0 : index
    %19 = vector.load %arg7[%c0_16, %c0_17] : memref<1x128xf32, #tpu.memory_space<vmem>>, vector<1x128xf32>
    %20 = vector.broadcast %19 : vector<1x128xf32> to vector<8x128xf32>
    %21 = arith.addf %18, %20 : vector<8x128xf32>
    %c0_18 = arith.constant 0 : index
    %c0_19 = arith.constant 0 : index
    %22 = vector.load %arg8[%c0_18, %c0_19] : memref<8x128xf32, #tpu.memory_space<vmem>>, vector<8x128xf32>
    tpu.vector_store %arg8[%c0_18, %c0_19], %21 {strides = array<i32>} : memref<8x128xf32, #tpu.memory_space<vmem>>, vector<8x128xf32>,
    return
  }
  func.func @transform_0(%arg0: i32) -> (i32, i32) {
    %c0_i32 = arith.constant 0 : i32
    %c0_i32_0 = arith.constant 0 : i32
    return %arg0, %c0_i32 : i32, i32
  }
  func.func @transform_1(%arg0: i32) -> (i32, i32) {
    %c0_i32 = arith.constant 0 : i32
    %c0_i32_0 = arith.constant 0 : i32
    %c0_i32_1 = arith.constant 0 : i32
    return %c0_i32, %c0_i32_0 : i32, i32
  }
  func.func @transform_2(%arg0: i32) -> (i32, i32) {
    %c0_i32 = arith.constant 0 : i32
    %c0_i32_0 = arith.constant 0 : i32
    %c0_i32_1 = arith.constant 0 : i32
    return %c0_i32, %c0_i32_0 : i32, i32
  }
  func.func @transform_3(%arg0: i32) -> (i32, i32) {
    %c0_i32 = arith.constant 0 : i32
    %c0_i32_0 = arith.constant 0 : i32
    %c0_i32_1 = arith.constant 0 : i32
    return %c0_i32, %c0_i32_0 : i32, i32
  }
  func.func @transform_4(%arg0: i32) -> (i32, i32) {
    %c0_i32 = arith.constant 0 : i32
    %c0_i32_0 = arith.constant 0 : i32
    %c0_i32_1 = arith.constant 0 : i32
    return %c0_i32, %c0_i32_0 : i32, i32
  }
  func.func @transform_5(%arg0: i32) -> (i32, i32) {
    %c0_i32 = arith.constant 0 : i32
    %c0_i32_0 = arith.constant 0 : i32
    %c0_i32_1 = arith.constant 0 : i32
    return %c0_i32, %c0_i32_0 : i32, i32
  }
  func.func @transform_6(%arg0: i32) -> (i32, i32) {
    %c0_i32 = arith.constant 0 : i32
    %c0_i32_0 = arith.constant 0 : i32
    %c0_i32_1 = arith.constant 0 : i32
    return %c0_i32, %c0_i32_0 : i32, i32
  }
  func.func @transform_7(%arg0: i32) -> (i32, i32) {
    %c0_i32 = arith.constant 0 : i32
    %c0_i32_0 = arith.constant 0 : i32
    return %arg0, %c0_i32 : i32, i32
  }
}

</mosaic_0001>

<bundles_post_ra>
// kernel: tpu_custom_call.1
= control target key start
LH: loop header
LB: loop body
LE: loop exit
PB: predicated region body
PF: predicated region fallthrough
CT: control target
= control target key end

     0   :  { %12 = vsyncpa [#allocation3], 0  ;;  %s1912_s0 = inlined_call_operand.hbm [shape: f32[8,256], index: 0, kind: input, shape index: {}]   ;;  %s1913_s1 = inlined_call_operand.hbm [shape: f32[256,512], index: 1, kind: input, shape index: {}]   ;;  %s1914_s2 = inlined_call_operand.hbm [shape: f32[1,512], index: 2, kind: input, shape index: {}]   ;;  %s1915_s3 = inlined_call_operand.hbm [shape: f32[512,768], index: 3, kind: input, shape index: {}]   ;;  %s1916_s4 = inlined_call_operand.hbm [shape: f32[1,768], index: 4, kind: input, shape index: {}]   ;;  %s1917_s5 = inlined_call_operand.hbm [shape: f32[768,128], index: 5, kind: input, shape index: {}]   ;;  %s1918_s6 = inlined_call_operand.hbm [shape: f32[1,128], index: 6, kind: input, shape index: {}]   ;;  %s1919_s7 = inlined_call_operand.hbm [shape: f32[8,128], index: 7, kind: output, shape index: {}]  }
   0x1   :  { %13 = vsyncpa [#allocation6], 0 }
   0x2   :  { %14 = vsyncpa [#allocation9], 0 }
   0x3   :  { %15 = vsyncpa [#allocation12], 0  ;;  %s32_s26 = sshll.u32 %s1913_s1, 4  ;;  %s33_s26 = int_to_ptr.hbm [resolvable:$true] %s32_s26 }
   0x4   :  { %16 = vsyncpa [#allocation4], 0  ;;  %s1776_s27 = smov [#allocation5]   ;;  %s56_s8 = sshll.u32 %s1915_s3, 4  ;;  %s57_s8 = int_to_ptr.hbm [resolvable:$true] %s56_s8 }
   0x5   :  { %s34_s28 = sshll.u32 %s1776_s27, 4  ;;  %s1777_s9 = smov 512   ;;  %s35_s28 = int_to_ptr.vmem [resolvable:$true] %s34_s28 }
   0x6   :  { %s1778_s10 = smov 32   ;;  %s1779_s11 = smov [#allocation8]  }
   0x7   :  { %40 = dma.hbm_to_vmem [thread:$0]  %s33_s26, 16384, %s35_s28, [#allocation6], %s1777_s9, %s1777_s9, %s1778_s10  }
   0x8   :  { %s58_s12 = sshll.u32 %s1779_s11, 4  ;;  %s1780_s13 = smov 768   ;;  %s59_s12 = int_to_ptr.vmem [resolvable:$true] %s58_s12 }
   0x9   :  { %s1781_s14 = smov 48   ;;  %s80_s16 = sshll.u32 %s1917_s5, 4  ;;  %s81_s16 = int_to_ptr.hbm [resolvable:$true] %s80_s16 }
   0xa   :  { %64 = dma.hbm_to_vmem [thread:$0]  %s57_s8, 49152, %s59_s12, [#allocation9], %s1780_s13, %s1780_s13, %s1781_s14  }
   0xb   :  { %s1782_s17 = smov [#allocation11]   ;;  %s22_s20 = sshll.u32 %s1912_s0, 4  ;;  %s23_s20 = int_to_ptr.hbm [resolvable:$true] %s22_s20 }
   0xc   :  { %s82_s18 = sshll.u32 %s1782_s17, 4  ;;  %s1783_s21 = smov 128   ;;  %s83_s18 = int_to_ptr.vmem [resolvable:$true] %s82_s18 }
   0xd   :  { %s1784_s22 = smov 8   ;;  %s1785_s23 = smov [#allocation2]  }
   0xe   :  { %88 = dma.hbm_to_vmem [thread:$0]  %s81_s16, 12288, %s83_s18, [#allocation12], %s1783_s21, %s1783_s21, %s1784_s22  }
   0xf   :  { %s24_s24 = sshll.u32 %s1785_s23, 4  ;;  %s46_s27 = sshll.u32 %s1914_s2, 4  ;;  %s25_s24 = int_to_ptr.vmem [resolvable:$true] %s24_s24  ;;  %s47_s27 = int_to_ptr.hbm [resolvable:$true] %s46_s27 }
  0x10   :  { %27 = dma.hbm_to_vmem [thread:$0]  %s23_s20, 256, %s25_s24, [#allocation3]  }
  0x11   :  { %s70_s29 = sshll.u32 %s1916_s4, 4  ;;  %s1786_s30 = smov [#allocation7]   ;;  %s71_s29 = int_to_ptr.hbm [resolvable:$true] %s70_s29 }
  0x12   :  { %s48_s8 = sshll.u32 %s1786_s30, 4  ;;  %s1787_s0 = smov [#allocation10]   ;;  %s49_s8 = int_to_ptr.vmem [resolvable:$true] %s48_s8 }
  0x13   :  { %51 = dma.hbm_to_vmem [thread:$0]  %s47_s27, 64, %s49_s8, [#allocation6]  }
  0x14   :  { %s72_s9 = sshll.u32 %s1787_s0, 4  ;;  %s94_s12 = sshll.u32 %s1918_s6, 4  ;;  %s73_s9 = int_to_ptr.vmem [resolvable:$true] %s72_s9  ;;  %s95_s12 = int_to_ptr.hbm [resolvable:$true] %s94_s12 }
  0x15   :  { %75 = dma.hbm_to_vmem [thread:$0]  %s71_s29, 96, %s73_s9, [#allocation9]  }
  0x16   :  { %s1788_s2 = smov [#allocation13]  }
  0x17   :  { %s96_s13 = sshll.u32 %s1788_s2, 4  ;;  %s97_s13 = int_to_ptr.vmem [resolvable:$true] %s96_s13 }
  0x18   :  { %99 = dma.hbm_to_vmem [thread:$0]  %s95_s12, 16, %s97_s13, [#allocation12]  }
  0x19   :  { %1766 = dma.done.wait [#allocation3], 256  }
  0x1a   :  { %1767 = vsyncadd [#allocation3], 4294967040 }
  0x1b   :  { %1768 = dma.done.wait [#allocation6], 16448  }
  0x1c   :  { %1769 = vsyncadd [#allocation6], 4294950848 }
  0x1d   :  { %1770 = dma.done.wait [#allocation9], 49248  }
  0x1e   :  { %1771 = vsyncadd [#allocation9], 4294918048 }
  0x1f   :  { %1772 = dma.done.wait [#allocation12], 12304  }
  0x20   :  { %1773 = vsyncadd [#allocation12], 4294954992  ;;  %v192_v0 = vld [vmem:[#allocation5 + $0x1e0] sm:$0xff]  ;;  %v193_v1 = vld [vmem:[#allocation5 + $0x1e8] sm:$0xff]  ;;  %s1789_s4 = smov [#allocation14]   ;;  %s1546_s15 = sshll.u32 %s1919_s7, 4  ;;  %s1547_s15 = int_to_ptr.hbm [resolvable:$true] %s1546_s15 }
  0x21   :  { %v188_v2 = vld [vmem:[#allocation5 + $0x1c0] sm:$0xff]  ;;  %270 = vmatpush.msra.mxu0 %v192_v0  ;;  %310 = vmatpush.msra.mxu2 %v193_v1  ;;  %v189_v4 = vld [vmem:[#allocation5 + $0x1c8] sm:$0xff]  ;;  %v128_v56 = vld [vmem:[#allocation2] sm:$0xff]  ;;  %s1544_s6 = sshll.u32 %s1789_s4, 4  ;;  %s1545_s6 = int_to_ptr.vmem [resolvable:$true] %s1544_s6 }
  0x22   :  { %v256_v3 = vld [vmem:[#allocation5 + $0x3e0] sm:$0xff]  ;;  %v257_v5 = vld [vmem:[#allocation5 + $0x3e8] sm:$0xff]  ;;  %v1851_v63 = vmax.f32 %v128_v56, 0.0  ;;  %v129_v0 = vld [vmem:[#allocation2 + $0x8] sm:$0xff] }
  0x23   :  { %290 = vmatpush.msra.mxu1 %v256_v3  ;;  %330 = vmatpush.msra.mxu3 %v257_v5  ;;  %v184_v6 = vld [vmem:[#allocation5 + $0x1a0] sm:$0xff]  ;;  %v185_v8 = vld [vmem:[#allocation5 + $0x1a8] sm:$0xff]  ;;  %v194_v1 = vld [vmem:[#allocation5 + $0x1f0] sm:$0xff]  ;;  %v1853_v5 = vmax.f32 %v129_v0, 0.0 }
  0x24   :  { %v252_v7 = vld [vmem:[#allocation5 + $0x3c0] sm:$0xff]  ;;  %271 = vmatpush.msra.mxu0 %v188_v2  ;;  %311 = vmatpush.msra.mxu2 %v189_v4  ;;  %v253_v9 = vld [vmem:[#allocation5 + $0x3c8] sm:$0xff]  ;;  %v195_v2 = vld [vmem:[#allocation5 + $0x1f8] sm:$0xff] }
  0x25   :  { %v248_v10 = vld [vmem:[#allocation5 + $0x3a0] sm:$0xff]  ;;  %291 = vmatpush.msra.mxu1 %v252_v7  ;;  %331 = vmatpush.msra.mxu3 %v253_v9  ;;  %v181_v12 = vld [vmem:[#allocation5 + $0x188] sm:$0xff]  ;;  %v258_v7 = vld [vmem:[#allocation5 + $0x3f0] sm:$0xff] }
  0x26   :  { %v180_v11 = vld [vmem:[#allocation5 + $0x180] sm:$0xff]  ;;  %v249_v13 = vld [vmem:[#allocation5 + $0x3a8] sm:$0xff]  ;;  %272 = vmatpush.msra.mxu0 %v184_v6  ;;  %312 = vmatpush.msra.mxu2 %v185_v8  ;;  %v190_v6 = vld [vmem:[#allocation5 + $0x1d0] sm:$0xff] }
  0x27   :  { %v244_v14 = vld [vmem:[#allocation5 + $0x380] sm:$0xff]  ;;  %v245_v15 = vld [vmem:[#allocation5 + $0x388] sm:$0xff]  ;;  %292 = vmatpush.msra.mxu1 %v248_v10  ;;  %332 = vmatpush.msra.mxu3 %v249_v13  ;;  %v191_v8 = vld [vmem:[#allocation5 + $0x1d8] sm:$0xff] }
  0x28   :  { %v176_v16 = vld [vmem:[#allocation5 + $0x160] sm:$0xff]  ;;  %v177_v17 = vld [vmem:[#allocation5 + $0x168] sm:$0xff]  ;;  %273 = vmatpush.msra.mxu0 %v180_v11  ;;  %313 = vmatpush.msra.mxu2 %v181_v12  ;;  %v259_v9 = vld [vmem:[#allocation5 + $0x3f8] sm:$0xff] }
  0x29   :  { %v240_v18 = vld [vmem:[#allocation5 + $0x360] sm:$0xff]  ;;  %v241_v19 = vld [vmem:[#allocation5 + $0x368] sm:$0xff]  ;;  %293 = vmatpush.msra.mxu1 %v244_v14  ;;  %333 = vmatpush.msra.mxu3 %v245_v15  ;;  %v186_v10 = vld [vmem:[#allocation5 + $0x1b0] sm:$0xff] }
  0x2a   :  { %v172_v20 = vld [vmem:[#allocation5 + $0x140] sm:$0xff]  ;;  %v173_v21 = vld [vmem:[#allocation5 + $0x148] sm:$0xff]  ;;  %274 = vmatpush.msra.mxu0 %v176_v16  ;;  %314 = vmatpush.msra.mxu2 %v177_v17  ;;  %v254_v11 = vld [vmem:[#allocation5 + $0x3d0] sm:$0xff] }
  0x2b   :  { %v236_v22 = vld [vmem:[#allocation5 + $0x340] sm:$0xff]  ;;  %v237_v23 = vld [vmem:[#allocation5 + $0x348] sm:$0xff]  ;;  %294 = vmatpush.msra.mxu1 %v240_v18  ;;  %334 = vmatpush.msra.mxu3 %v241_v19  ;;  %v187_v12 = vld [vmem:[#allocation5 + $0x1b8] sm:$0xff] }
  0x2c   :  { %v168_v24 = vld [vmem:[#allocation5 + $0x120] sm:$0xff]  ;;  %v169_v25 = vld [vmem:[#allocation5 + $0x128] sm:$0xff]  ;;  %275 = vmatpush.msra.mxu0 %v172_v20  ;;  %315 = vmatpush.msra.mxu2 %v173_v21  ;;  %v255_v13 = vld [vmem:[#allocation5 + $0x3d8] sm:$0xff] }
  0x2d   :  { %v232_v26 = vld [vmem:[#allocation5 + $0x320] sm:$0xff]  ;;  %v233_v27 = vld [vmem:[#allocation5 + $0x328] sm:$0xff]  ;;  %295 = vmatpush.msra.mxu1 %v236_v22  ;;  %335 = vmatpush.msra.mxu3 %v237_v23  ;;  %v182_v14 = vld [vmem:[#allocation5 + $0x190] sm:$0xff] }
  0x2e   :  { %v164_v28 = vld [vmem:[#allocation5 + $0x100] sm:$0xff]  ;;  %v165_v29 = vld [vmem:[#allocation5 + $0x108] sm:$0xff]  ;;  %276 = vmatpush.msra.mxu0 %v168_v24  ;;  %316 = vmatpush.msra.mxu2 %v169_v25  ;;  %v250_v15 = vld [vmem:[#allocation5 + $0x3b0] sm:$0xff] }
  0x2f   :  { %v228_v30 = vld [vmem:[#allocation5 + $0x300] sm:$0xff]  ;;  %v229_v31 = vld [vmem:[#allocation5 + $0x308] sm:$0xff]  ;;  %296 = vmatpush.msra.mxu1 %v232_v26  ;;  %336 = vmatpush.msra.mxu3 %v233_v27  ;;  %v183_v16 = vld [vmem:[#allocation5 + $0x198] sm:$0xff] }
  0x30   :  { %v160_v32 = vld [vmem:[#allocation5 + $0xe0] sm:$0xff]  ;;  %v161_v33 = vld [vmem:[#allocation5 + $0xe8] sm:$0xff]  ;;  %277 = vmatpush.msra.mxu0 %v164_v28  ;;  %317 = vmatpush.msra.mxu2 %v165_v29  ;;  %v251_v17 = vld [vmem:[#allocation5 + $0x3b8] sm:$0xff] }
  0x31   :  { %v224_v34 = vld [vmem:[#allocation5 + $0x2e0] sm:$0xff]  ;;  %v225_v35 = vld [vmem:[#allocation5 + $0x2e8] sm:$0xff]  ;;  %297 = vmatpush.msra.mxu1 %v228_v30  ;;  %337 = vmatpush.msra.mxu3 %v229_v31  ;;  %v178_v18 = vld [vmem:[#allocation5 + $0x170] sm:$0xff] }
  0x32   :  { %v156_v36 = vld [vmem:[#allocation5 + $0xc0] sm:$0xff]  ;;  %v157_v37 = vld [vmem:[#allocation5 + $0xc8] sm:$0xff]  ;;  %278 = vmatpush.msra.mxu0 %v160_v32  ;;  %318 = vmatpush.msra.mxu2 %v161_v33  ;;  %v246_v19 = vld [vmem:[#allocation5 + $0x390] sm:$0xff] }
  0x33   :  { %v220_v38 = vld [vmem:[#allocation5 + $0x2c0] sm:$0xff]  ;;  %v221_v39 = vld [vmem:[#allocation5 + $0x2c8] sm:$0xff]  ;;  %298 = vmatpush.msra.mxu1 %v224_v34  ;;  %338 = vmatpush.msra.mxu3 %v225_v35  ;;  %v179_v20 = vld [vmem:[#allocation5 + $0x178] sm:$0xff] }
  0x34   :  { %v152_v40 = vld [vmem:[#allocation5 + $0xa0] sm:$0xff]  ;;  %v153_v41 = vld [vmem:[#allocation5 + $0xa8] sm:$0xff]  ;;  %279 = vmatpush.msra.mxu0 %v156_v36  ;;  %319 = vmatpush.msra.mxu2 %v157_v37  ;;  %v247_v21 = vld [vmem:[#allocation5 + $0x398] sm:$0xff] }
  0x35   :  { %v216_v42 = vld [vmem:[#allocation5 + $0x2a0] sm:$0xff]  ;;  %v217_v43 = vld [vmem:[#allocation5 + $0x2a8] sm:$0xff]  ;;  %299 = vmatpush.msra.mxu1 %v220_v38  ;;  %339 = vmatpush.msra.mxu3 %v221_v39  ;;  %v174_v22 = vld [vmem:[#allocation5 + $0x150] sm:$0xff] }
  0x36   :  { %v148_v44 = vld [vmem:[#allocation5 + $0x80] sm:$0xff]  ;;  %v149_v45 = vld [vmem:[#allocation5 + $0x88] sm:$0xff]  ;;  %280 = vmatpush.msra.mxu0 %v152_v40  ;;  %320 = vmatpush.msra.mxu2 %v153_v41  ;;  %v242_v23 = vld [vmem:[#allocation5 + $0x370] sm:$0xff] }
  0x37   :  { %v212_v46 = vld [vmem:[#allocation5 + $0x280] sm:$0xff]  ;;  %v213_v47 = vld [vmem:[#allocation5 + $0x288] sm:$0xff]  ;;  %300 = vmatpush.msra.mxu1 %v216_v42  ;;  %340 = vmatpush.msra.mxu3 %v217_v43  ;;  %v175_v24 = vld [vmem:[#allocation5 + $0x158] sm:$0xff] }
  0x38   :  { %v144_v48 = vld [vmem:[#allocation5 + $0x60] sm:$0xff]  ;;  %v145_v49 = vld [vmem:[#allocation5 + $0x68] sm:$0xff]  ;;  %281 = vmatpush.msra.mxu0 %v148_v44  ;;  %321 = vmatpush.msra.mxu2 %v149_v45  ;;  %v243_v25 = vld [vmem:[#allocation5 + $0x378] sm:$0xff] }
  0x39   :  { %v208_v50 = vld [vmem:[#allocation5 + $0x260] sm:$0xff]  ;;  %v209_v51 = vld [vmem:[#allocation5 + $0x268] sm:$0xff]  ;;  %301 = vmatpush.msra.mxu1 %v212_v46  ;;  %341 = vmatpush.msra.mxu3 %v213_v47  ;;  %v170_v26 = vld [vmem:[#allocation5 + $0x130] sm:$0xff] }
  0x3a   :  { %v140_v52 = vld [vmem:[#allocation5 + $0x40] sm:$0xff]  ;;  %v141_v53 = vld [vmem:[#allocation5 + $0x48] sm:$0xff]  ;;  %282 = vmatpush.msra.mxu0 %v144_v48  ;;  %322 = vmatpush.msra.mxu2 %v145_v49  ;;  %v238_v27 = vld [vmem:[#allocation5 + $0x350] sm:$0xff] }
  0x3b   :  { %v204_v54 = vld [vmem:[#allocation5 + $0x240] sm:$0xff]  ;;  %v205_v55 = vld [vmem:[#allocation5 + $0x248] sm:$0xff]  ;;  %302 = vmatpush.msra.mxu1 %v208_v50  ;;  %342 = vmatpush.msra.mxu3 %v209_v51  ;;  %v171_v28 = vld [vmem:[#allocation5 + $0x138] sm:$0xff] }
  0x3c   :  { %v136_v57 = vld [vmem:[#allocation5 + $0x20] sm:$0xff]  ;;  %v137_v58 = vld [vmem:[#allocation5 + $0x28] sm:$0xff]  ;;  %283 = vmatpush.msra.mxu0 %v140_v52  ;;  %323 = vmatpush.msra.mxu2 %v141_v53  ;;  %v239_v29 = vld [vmem:[#allocation5 + $0x358] sm:$0xff] }
  0x3d   :  { %v200_v59 = vld [vmem:[#allocation5 + $0x220] sm:$0xff]  ;;  %v201_v60 = vld [vmem:[#allocation5 + $0x228] sm:$0xff]  ;;  %303 = vmatpush.msra.mxu1 %v204_v54  ;;  %343 = vmatpush.msra.mxu3 %v205_v55  ;;  %v166_v30 = vld [vmem:[#allocation5 + $0x110] sm:$0xff] }
  0x3e   :  { %v132_v61 = vld [vmem:[#allocation5] sm:$0xff]  ;;  %v133_v62 = vld [vmem:[#allocation5 + $0x8] sm:$0xff]  ;;  %284 = vmatpush.msra.mxu0 %v136_v57  ;;  %324 = vmatpush.msra.mxu2 %v137_v58  ;;  %v234_v31 = vld [vmem:[#allocation5 + $0x330] sm:$0xff] }
  0x3f   :  { %304 = vmatpush.msra.mxu1 %v200_v59  ;;  %344 = vmatpush.msra.mxu3 %v201_v60  ;;  %v196_v3 = vld [vmem:[#allocation5 + $0x200] sm:$0xff]  ;;  %v197_v4 = vld [vmem:[#allocation5 + $0x208] sm:$0xff]  ;;  %v167_v32 = vld [vmem:[#allocation5 + $0x118] sm:$0xff] }
  0x40   :  { %285 = vmatpush.msra.mxu0 %v132_v61  ;;  %325 = vmatpush.msra.mxu2 %v133_v62  ;;  %v235_v33 = vld [vmem:[#allocation5 + $0x338] sm:$0xff]  ;;  %v162_v34 = vld [vmem:[#allocation5 + $0xf0] sm:$0xff] }
  0x41   :  { %286 = vmatmul.f32.vlgmr.msra.gmra.mxu0 %v1851_v63  ;;  %326 = vmatmul.f32.vlgmr.msra.gmra.mxu2 %v1851_v63  ;;  %v230_v35 = vld [vmem:[#allocation5 + $0x310] sm:$0xff]  ;;  %v163_v36 = vld [vmem:[#allocation5 + $0xf8] sm:$0xff] }
  0x42   :  { %350 = vmatpush.msrb.mxu0 %v194_v1  ;;  %390 = vmatpush.msrb.mxu2 %v195_v2  ;;  %v231_v37 = vld [vmem:[#allocation5 + $0x318] sm:$0xff]  ;;  %v158_v38 = vld [vmem:[#allocation5 + $0xd0] sm:$0xff] }
  0x43   :  { %305 = vmatpush.msra.mxu1 %v196_v3  ;;  %345 = vmatpush.msra.mxu3 %v197_v4  ;;  %v226_v39 = vld [vmem:[#allocation5 + $0x2f0] sm:$0xff]  ;;  %v159_v40 = vld [vmem:[#allocation5 + $0xd8] sm:$0xff] }
  0x44   :  { %306 = vmatmul.f32.vlgmr.msra.gmra.mxu1 %v1853_v5  ;;  %346 = vmatmul.f32.vlgmr.msra.gmra.mxu3 %v1853_v5  ;;  %v227_v41 = vld [vmem:[#allocation5 + $0x2f8] sm:$0xff]  ;;  %v154_v42 = vld [vmem:[#allocation5 + $0xb0] sm:$0xff] }
  0x45   :  { %351 = vmatpush.msrb.mxu0 %v190_v6  ;;  %370 = vmatpush.msrb.mxu1 %v258_v7  ;;  %v222_v43 = vld [vmem:[#allocation5 + $0x2d0] sm:$0xff]  ;;  %v155_v44 = vld [vmem:[#allocation5 + $0xb8] sm:$0xff] }
  0x46   :  { %391 = vmatpush.msrb.mxu2 %v191_v8  ;;  %410 = vmatpush.msrb.mxu3 %v259_v9  ;;  %v223_v45 = vld [vmem:[#allocation5 + $0x2d8] sm:$0xff]  ;;  %v150_v46 = vld [vmem:[#allocation5 + $0x90] sm:$0xff]  ;;  %v518_v9 = vld [vmem:[#allocation8 + $0x2a0] sm:$0xff] }
  0x47   :  { %352 = vmatpush.msrb.mxu0 %v186_v10  ;;  %371 = vmatpush.msrb.mxu1 %v254_v11  ;;  %v218_v47 = vld [vmem:[#allocation5 + $0x2b0] sm:$0xff]  ;;  %v151_v48 = vld [vmem:[#allocation5 + $0x98] sm:$0xff]  ;;  %v614_v10 = vld [vmem:[#allocation8 + $0x5a0] sm:$0xff] }
  0x48   :  { %392 = vmatpush.msrb.mxu2 %v187_v12  ;;  %411 = vmatpush.msrb.mxu3 %v255_v13  ;;  %v219_v49 = vld [vmem:[#allocation5 + $0x2b8] sm:$0xff]  ;;  %v146_v50 = vld [vmem:[#allocation5 + $0x70] sm:$0xff]  ;;  %v710_v11 = vld [vmem:[#allocation8 + $0x8a0] sm:$0xff] }
  0x49   :  { %353 = vmatpush.msrb.mxu0 %v182_v14  ;;  %372 = vmatpush.msrb.mxu1 %v250_v15  ;;  %v214_v51 = vld [vmem:[#allocation5 + $0x290] sm:$0xff]  ;;  %v147_v52 = vld [vmem:[#allocation5 + $0x78] sm:$0xff]  ;;  %v506_v14 = vld [vmem:[#allocation8 + $0x240] sm:$0xff] }
  0x4a   :  { %393 = vmatpush.msrb.mxu2 %v183_v16  ;;  %412 = vmatpush.msrb.mxu3 %v251_v17  ;;  %v215_v53 = vld [vmem:[#allocation5 + $0x298] sm:$0xff]  ;;  %v142_v54 = vld [vmem:[#allocation5 + $0x50] sm:$0xff]  ;;  %v602_v15 = vld [vmem:[#allocation8 + $0x540] sm:$0xff] }
  0x4b   :  { %354 = vmatpush.msrb.mxu0 %v178_v18  ;;  %373 = vmatpush.msrb.mxu1 %v246_v19  ;;  %v210_v55 = vld [vmem:[#allocation5 + $0x270] sm:$0xff]  ;;  %v143_v56 = vld [vmem:[#allocation5 + $0x58] sm:$0xff]  ;;  %v698_v17 = vld [vmem:[#allocation8 + $0x840] sm:$0xff] }
  0x4c   :  { %394 = vmatpush.msrb.mxu2 %v179_v20  ;;  %413 = vmatpush.msrb.mxu3 %v247_v21  ;;  %v211_v57 = vld [vmem:[#allocation5 + $0x278] sm:$0xff]  ;;  %v138_v58 = vld [vmem:[#allocation5 + $0x30] sm:$0xff]  ;;  %v806_v19 = vld [vmem:[#allocation8 + $0xba0] sm:$0xff] }
  0x4d   :  { %355 = vmatpush.msrb.mxu0 %v174_v22  ;;  %374 = vmatpush.msrb.mxu1 %v242_v23  ;;  %v206_v59 = vld [vmem:[#allocation5 + $0x250] sm:$0xff]  ;;  %v139_v60 = vld [vmem:[#allocation5 + $0x38] sm:$0xff]  ;;  %v494_v21 = vld [vmem:[#allocation8 + $0x1e0] sm:$0xff] }
  0x4e   :  { %395 = vmatpush.msrb.mxu2 %v175_v24  ;;  %414 = vmatpush.msrb.mxu3 %v243_v25  ;;  %v207_v61 = vld [vmem:[#allocation5 + $0x258] sm:$0xff]  ;;  %v134_v62 = vld [vmem:[#allocation5 + $0x10] sm:$0xff]  ;;  %v590_v22 = vld [vmem:[#allocation8 + $0x4e0] sm:$0xff] }
  0x4f   :  { %356 = vmatpush.msrb.mxu0 %v170_v26  ;;  %375 = vmatpush.msrb.mxu1 %v238_v27  ;;  %v202_v0 = vld [vmem:[#allocation5 + $0x230] sm:$0xff]  ;;  %v135_v1 = vld [vmem:[#allocation5 + $0x18] sm:$0xff]  ;;  %v686_v24 = vld [vmem:[#allocation8 + $0x7e0] sm:$0xff] }
  0x50   :  { %396 = vmatpush.msrb.mxu2 %v171_v28  ;;  %415 = vmatpush.msrb.mxu3 %v239_v29  ;;  %v203_v2 = vld [vmem:[#allocation5 + $0x238] sm:$0xff]  ;;  %v198_v3 = vld [vmem:[#allocation5 + $0x210] sm:$0xff]  ;;  %v794_v27 = vld [vmem:[#allocation8 + $0xb40] sm:$0xff] }
  0x51   :  { %357 = vmatpush.msrb.mxu0 %v166_v30  ;;  %376 = vmatpush.msrb.mxu1 %v234_v31  ;;  %v199_v4 = vld [vmem:[#allocation5 + $0x218] sm:$0xff]  ;;  %v482_v29 = vld [vmem:[#allocation8 + $0x180] sm:$0xff] }
  0x52   :  { %397 = vmatpush.msrb.mxu2 %v167_v32  ;;  %416 = vmatpush.msrb.mxu3 %v235_v33  ;;  %v524_v6 = vld [vmem:[#allocation8 + $0x2d0] sm:$0xff]  ;;  %v578_v30 = vld [vmem:[#allocation8 + $0x480] sm:$0xff] }
  0x53   :  { %358 = vmatpush.msrb.mxu0 %v162_v34  ;;  %377 = vmatpush.msrb.mxu1 %v230_v35  ;;  %v620_v7 = vld [vmem:[#allocation8 + $0x5d0] sm:$0xff]  ;;  %v674_v32 = vld [vmem:[#allocation8 + $0x780] sm:$0xff] }
  0x54   :  { %398 = vmatpush.msrb.mxu2 %v163_v36  ;;  %417 = vmatpush.msrb.mxu3 %v231_v37  ;;  %v716_v8 = vld [vmem:[#allocation8 + $0x8d0] sm:$0xff]  ;;  %v782_v35 = vld [vmem:[#allocation8 + $0xae0] sm:$0xff] }
  0x55   :  { %359 = vmatpush.msrb.mxu0 %v158_v38  ;;  %378 = vmatpush.msrb.mxu1 %v226_v39  ;;  %v512_v12 = vld [vmem:[#allocation8 + $0x270] sm:$0xff]  ;;  %v470_v37 = vld [vmem:[#allocation8 + $0x120] sm:$0xff] }
  0x56   :  { %399 = vmatpush.msrb.mxu2 %v159_v40  ;;  %418 = vmatpush.msrb.mxu3 %v227_v41  ;;  %v608_v13 = vld [vmem:[#allocation8 + $0x570] sm:$0xff]  ;;  %v566_v38 = vld [vmem:[#allocation8 + $0x420] sm:$0xff] }
  0x57   :  { %360 = vmatpush.msrb.mxu0 %v154_v42  ;;  %379 = vmatpush.msrb.mxu1 %v222_v43  ;;  %v812_v16 = vld [vmem:[#allocation8 + $0xbd0] sm:$0xff]  ;;  %v662_v40 = vld [vmem:[#allocation8 + $0x720] sm:$0xff] }
  0x58   :  { %400 = vmatpush.msrb.mxu2 %v155_v44  ;;  %419 = vmatpush.msrb.mxu3 %v223_v45  ;;  %v500_v18 = vld [vmem:[#allocation8 + $0x210] sm:$0xff]  ;;  %v770_v43 = vld [vmem:[#allocation8 + $0xa80] sm:$0xff] }
  0x59   :  { %361 = vmatpush.msrb.mxu0 %v150_v46  ;;  %380 = vmatpush.msrb.mxu1 %v218_v47  ;;  %v692_v20 = vld [vmem:[#allocation8 + $0x810] sm:$0xff]  ;;  %v458_v45 = vld [vmem:[#allocation8 + $0xc0] sm:$0xff] }
  0x5a   :  { %401 = vmatpush.msrb.mxu2 %v151_v48  ;;  %420 = vmatpush.msrb.mxu3 %v219_v49  ;;  %v800_v23 = vld [vmem:[#allocation8 + $0xb70] sm:$0xff]  ;;  %v554_v46 = vld [vmem:[#allocation8 + $0x3c0] sm:$0xff] }
  0x5b   :  { %362 = vmatpush.msrb.mxu0 %v146_v50  ;;  %381 = vmatpush.msrb.mxu1 %v214_v51  ;;  %v488_v25 = vld [vmem:[#allocation8 + $0x1b0] sm:$0xff]  ;;  %v650_v48 = vld [vmem:[#allocation8 + $0x6c0] sm:$0xff] }
  0x5c   :  { %402 = vmatpush.msrb.mxu2 %v147_v52  ;;  %421 = vmatpush.msrb.mxu3 %v215_v53  ;;  %v584_v26 = vld [vmem:[#allocation8 + $0x4b0] sm:$0xff]  ;;  %v446_v51 = vld [vmem:[#allocation8 + $0x60] sm:$0xff] }
  0x5d   :  { %363 = vmatpush.msrb.mxu0 %v142_v54  ;;  %382 = vmatpush.msrb.mxu1 %v210_v55  ;;  %v680_v28 = vld [vmem:[#allocation8 + $0x7b0] sm:$0xff]  ;;  %v542_v52 = vld [vmem:[#allocation8 + $0x360] sm:$0xff] }
  0x5e   :  { %403 = vmatpush.msrb.mxu2 %v143_v56  ;;  %422 = vmatpush.msrb.mxu3 %v211_v57  ;;  %v788_v31 = vld [vmem:[#allocation8 + $0xb10] sm:$0xff]  ;;  %v434_v55 = vld [vmem:[#allocation8] sm:$0xff]  ;;  %v525_v57 = vld [vmem:[#allocation8 + $0x2d8] sm:$0xff] }
  0x5f   :  { %364 = vmatpush.msrb.mxu0 %v138_v58  ;;  %383 = vmatpush.msrb.mxu1 %v206_v59  ;;  %v476_v33 = vld [vmem:[#allocation8 + $0x150] sm:$0xff]  ;;  %v530_v56 = vld [vmem:[#allocation8 + $0x300] sm:$0xff]  ;;  %v621_v58 = vld [vmem:[#allocation8 + $0x5d8] sm:$0xff] }
  0x60   :  { %404 = vmatpush.msrb.mxu2 %v139_v60  ;;  %423 = vmatpush.msrb.mxu3 %v207_v61  ;;  %v572_v34 = vld [vmem:[#allocation8 + $0x450] sm:$0xff]  ;;  %v519_v59 = vld [vmem:[#allocation8 + $0x2a8] sm:$0xff]  ;;  %v513_v61 = vld [vmem:[#allocation8 + $0x278] sm:$0xff] }
  0x61   :  { %365 = vmatpush.msrb.mxu0 %v134_v62  ;;  %384 = vmatpush.msrb.mxu1 %v202_v0  ;;  %v668_v36 = vld [vmem:[#allocation8 + $0x750] sm:$0xff]  ;;  %v615_v60 = vld [vmem:[#allocation8 + $0x5a8] sm:$0xff]  ;;  %v609_v62 = vld [vmem:[#allocation8 + $0x578] sm:$0xff] }
  0x62   :  { %405 = vmatpush.msrb.mxu2 %v135_v1  ;;  %424 = vmatpush.msrb.mxu3 %v203_v2  ;;  %v776_v39 = vld [vmem:[#allocation8 + $0xab0] sm:$0xff]  ;;  %v507_v0 = vld [vmem:[#allocation8 + $0x248] sm:$0xff]  ;;  %v501_v2 = vld [vmem:[#allocation8 + $0x218] sm:$0xff] }
  0x63   :  { %366 = vmatmul.f32.vlgmr.msrb.gmra.mxu0 %v1851_v63  ;;  %406 = vmatmul.f32.vlgmr.msrb.gmra.mxu2 %v1851_v63  ;;  %v704_v63 = vld [vmem:[#allocation8 + $0x870] sm:$0xff]  ;;  %v603_v1 = vld [vmem:[#allocation8 + $0x548] sm:$0xff] }
  0x64   :  { %385 = vmatpush.msrb.mxu1 %v198_v3  ;;  %425 = vmatpush.msrb.mxu3 %v199_v4  ;;  %v464_v41 = vld [vmem:[#allocation8 + $0xf0] sm:$0xff]  ;;  %v597_v3 = vld [vmem:[#allocation8 + $0x518] sm:$0xff]  ;;  %v495_v4 = vld [vmem:[#allocation8 + $0x1e8] sm:$0xff] }
  0x65   :  { %386 = vmatmul.f32.vlgmr.msrb.gmra.mxu1 %v1853_v5  ;;  %426 = vmatmul.f32.vlgmr.msrb.gmra.mxu3 %v1853_v5  ;;  %v596_v5 = vld [vmem:[#allocation8 + $0x510] sm:$0xff] }
  0x66   :  { %832 = vmatpush.msra.mxu0 %v524_v6  ;;  %852 = vmatpush.msra.mxu1 %v620_v7  ;;  %v560_v42 = vld [vmem:[#allocation8 + $0x3f0] sm:$0xff]  ;;  %v591_v6 = vld [vmem:[#allocation8 + $0x4e8] sm:$0xff]  ;;  %v489_v7 = vld [vmem:[#allocation8 + $0x1b8] sm:$0xff] }
  0x67   :  { %872 = vmatpush.msra.mxu2 %v716_v8  ;;  %892 = vmatpush.msra.mxu3 %v812_v16  ;;  %v656_v44 = vld [vmem:[#allocation8 + $0x6f0] sm:$0xff]  ;;  %v585_v8 = vld [vmem:[#allocation8 + $0x4b8] sm:$0xff]  ;;  %v758_v16 = vld [vmem:[#allocation8 + $0xa20] sm:$0xff] }
  0x68   :  { %833 = vmatpush.msra.mxu0 %v518_v9  ;;  %853 = vmatpush.msra.mxu1 %v614_v10  ;;  %v764_v47 = vld [vmem:[#allocation8 + $0xa50] sm:$0xff]  ;;  %v483_v9 = vld [vmem:[#allocation8 + $0x188] sm:$0xff] }
  0x69   :  { %873 = vmatpush.msra.mxu2 %v710_v11  ;;  %893 = vmatpush.msra.mxu3 %v806_v19  ;;  %v452_v49 = vld [vmem:[#allocation8 + $0x90] sm:$0xff]  ;;  %v579_v10 = vld [vmem:[#allocation8 + $0x488] sm:$0xff]  ;;  %v477_v11 = vld [vmem:[#allocation8 + $0x158] sm:$0xff] }
  0x6a   :  { %834 = vmatpush.msra.mxu0 %v512_v12  ;;  %854 = vmatpush.msra.mxu1 %v608_v13  ;;  %v548_v50 = vld [vmem:[#allocation8 + $0x390] sm:$0xff]  ;;  %v573_v12 = vld [vmem:[#allocation8 + $0x458] sm:$0xff]  ;;  %v471_v13 = vld [vmem:[#allocation8 + $0x128] sm:$0xff] }
  0x6b   :  { %874 = vmatpush.msra.mxu2 %v704_v63  ;;  %894 = vmatpush.msra.mxu3 %v800_v23  ;;  %v440_v53 = vld [vmem:[#allocation8 + $0x30] sm:$0xff]  ;;  %v465_v63 = vld [vmem:[#allocation8 + $0xf8] sm:$0xff]  ;;  %v746_v23 = vld [vmem:[#allocation8 + $0x9c0] sm:$0xff] }
  0x6c   :  { %835 = vmatpush.msra.mxu0 %v506_v14  ;;  %855 = vmatpush.msra.mxu1 %v602_v15  ;;  %v536_v54 = vld [vmem:[#allocation8 + $0x330] sm:$0xff]  ;;  %v459_v14 = vld [vmem:[#allocation8 + $0xc8] sm:$0xff] }
  0x6d   :  { %875 = vmatpush.msra.mxu2 %v698_v17  ;;  %895 = vmatpush.msra.mxu3 %v794_v27  ;;  %v644_v15 = vld [vmem:[#allocation8 + $0x690] sm:$0xff]  ;;  %v453_v17 = vld [vmem:[#allocation8 + $0x98] sm:$0xff] }
  0x6e   :  { %836 = vmatpush.msra.mxu0 %v500_v18  ;;  %856 = vmatpush.msra.mxu1 %v596_v5  ;;  %v567_v18 = vld [vmem:[#allocation8 + $0x428] sm:$0xff]  ;;  %v638_v5 = vld [vmem:[#allocation8 + $0x660] sm:$0xff]  ;;  %v752_v19 = vld [vmem:[#allocation8 + $0x9f0] sm:$0xff] }
  0x6f   :  { %876 = vmatpush.msra.mxu2 %v692_v20  ;;  %896 = vmatpush.msra.mxu3 %v788_v31  ;;  %v447_v20 = vld [vmem:[#allocation8 + $0x68] sm:$0xff]  ;;  %v740_v27 = vld [vmem:[#allocation8 + $0x990] sm:$0xff]  ;;  %v734_v31 = vld [vmem:[#allocation8 + $0x960] sm:$0xff] }
  0x70   :  { %837 = vmatpush.msra.mxu0 %v494_v21  ;;  %857 = vmatpush.msra.mxu1 %v590_v22  ;;  %v561_v21 = vld [vmem:[#allocation8 + $0x3f8] sm:$0xff]  ;;  %v632_v22 = vld [vmem:[#allocation8 + $0x630] sm:$0xff] }
  0x71   :  { %877 = vmatpush.msra.mxu2 %v686_v24  ;;  %897 = vmatpush.msra.mxu3 %v782_v35  ;;  %v441_v24 = vld [vmem:[#allocation8 + $0x38] sm:$0xff] }
  0x72   :  { %838 = vmatpush.msra.mxu0 %v488_v25  ;;  %858 = vmatpush.msra.mxu1 %v584_v26  ;;  %v555_v25 = vld [vmem:[#allocation8 + $0x3c8] sm:$0xff]  ;;  %v626_v26 = vld [vmem:[#allocation8 + $0x600] sm:$0xff]  ;;  %v537_v35 = vld [vmem:[#allocation8 + $0x338] sm:$0xff] }
  0x73   :  { %878 = vmatpush.msra.mxu2 %v680_v28  ;;  %898 = vmatpush.msra.mxu3 %v776_v39  ;;  %v435_v28 = vld [vmem:[#allocation8 + $0x8] sm:$0xff] }
  0x74   :  { %839 = vmatpush.msra.mxu0 %v482_v29  ;;  %859 = vmatpush.msra.mxu1 %v578_v30  ;;  %v549_v29 = vld [vmem:[#allocation8 + $0x398] sm:$0xff]  ;;  %v699_v39 = vld [vmem:[#allocation8 + $0x848] sm:$0xff] }
  0x75   :  { %879 = vmatpush.msra.mxu2 %v674_v32  ;;  %899 = vmatpush.msra.mxu3 %v770_v43  ;;  %v717_v30 = vld [vmem:[#allocation8 + $0x8d8] sm:$0xff]  ;;  %v543_v32 = vld [vmem:[#allocation8 + $0x368] sm:$0xff] }
  0x76   :  { %840 = vmatpush.msra.mxu0 %v476_v33  ;;  %860 = vmatpush.msra.mxu1 %v572_v34  ;;  %v711_v33 = vld [vmem:[#allocation8 + $0x8a8] sm:$0xff]  ;;  %v728_v34 = vld [vmem:[#allocation8 + $0x930] sm:$0xff]  ;;  %v801_v43 = vld [vmem:[#allocation8 + $0xb78] sm:$0xff] }
  0x77   :  { %880 = vmatpush.msra.mxu2 %v668_v36  ;;  %900 = vmatpush.msra.mxu3 %v764_v47  ;;  %v705_v36 = vld [vmem:[#allocation8 + $0x878] sm:$0xff] }
  0x78   :  { %841 = vmatpush.msra.mxu0 %v470_v37  ;;  %861 = vmatpush.msra.mxu1 %v566_v38  ;;  %v722_v37 = vld [vmem:[#allocation8 + $0x900] sm:$0xff]  ;;  %v531_v38 = vld [vmem:[#allocation8 + $0x308] sm:$0xff]  ;;  %v789_v47 = vld [vmem:[#allocation8 + $0xb18] sm:$0xff] }
  0x79   :  { %881 = vmatpush.msra.mxu2 %v662_v40  ;;  %901 = vmatpush.msra.mxu3 %v758_v16  ;;  %v813_v40 = vld [vmem:[#allocation8 + $0xbd8] sm:$0xff]  ;;  %v514_v16 = vld [vmem:[#allocation8 + $0x280] sm:$0xff] }
  0x7a   :  { %842 = vmatpush.msra.mxu0 %v464_v41  ;;  %862 = vmatpush.msra.mxu1 %v560_v42  ;;  %v807_v41 = vld [vmem:[#allocation8 + $0xba8] sm:$0xff]  ;;  %v693_v42 = vld [vmem:[#allocation8 + $0x818] sm:$0xff] }
  0x7b   :  { %882 = vmatpush.msra.mxu2 %v656_v44  ;;  %902 = vmatpush.msra.mxu3 %v752_v19  ;;  %v687_v44 = vld [vmem:[#allocation8 + $0x7e8] sm:$0xff]  ;;  %v622_v19 = vld [vmem:[#allocation8 + $0x5e0] sm:$0xff] }
  0x7c   :  { %843 = vmatpush.msra.mxu0 %v458_v45  ;;  %863 = vmatpush.msra.mxu1 %v554_v46  ;;  %v795_v45 = vld [vmem:[#allocation8 + $0xb48] sm:$0xff]  ;;  %v681_v46 = vld [vmem:[#allocation8 + $0x7b8] sm:$0xff] }
  0x7d   :  { %883 = vmatpush.msra.mxu2 %v650_v48  ;;  %903 = vmatpush.msra.mxu3 %v746_v23  ;;  %v675_v48 = vld [vmem:[#allocation8 + $0x788] sm:$0xff] }
  0x7e   :  { %844 = vmatpush.msra.mxu0 %v452_v49  ;;  %864 = vmatpush.msra.mxu1 %v548_v50  ;;  %v783_v49 = vld [vmem:[#allocation8 + $0xae8] sm:$0xff]  ;;  %v669_v50 = vld [vmem:[#allocation8 + $0x758] sm:$0xff] }
  0x7f   :  { %884 = vmatpush.msra.mxu2 %v644_v15  ;;  %904 = vmatpush.msra.mxu3 %v740_v27  ;;  %v723_v23 = vld [vmem:[#allocation8 + $0x908] sm:$0xff]  ;;  %v604_v27 = vld [vmem:[#allocation8 + $0x550] sm:$0xff] }
  0x80   :  { %845 = vmatpush.msra.mxu0 %v446_v51  ;;  %865 = vmatpush.msra.mxu1 %v542_v52  ;;  %v777_v51 = vld [vmem:[#allocation8 + $0xab8] sm:$0xff] }
  0x81   :  { %885 = vmatpush.msra.mxu2 %v638_v5  ;;  %905 = vmatpush.msra.mxu3 %v734_v31  ;;  %v1863_v52 = vld [vmem:[#allocation7] sm:$0xf]  ;;  %v508_v5 = vld [vmem:[#allocation8 + $0x250] sm:$0xff] }
  0x82   :  { %846 = vmatpush.msra.mxu0 %v440_v53  ;;  %866 = vmatpush.msra.mxu1 %v536_v54  ;;  %v663_v53 = vld [vmem:[#allocation8 + $0x728] sm:$0xff]  ;;  %v592_v31 = vld [vmem:[#allocation8 + $0x4f0] sm:$0xff] }
  0x83   :  { %886 = vmatpush.msra.mxu2 %v632_v22  ;;  %906 = vmatpush.msra.mxu3 %v728_v34  ;;  %v771_v54 = vld [vmem:[#allocation8 + $0xa88] sm:$0xff]  ;;  %v616_v22 = vld [vmem:[#allocation8 + $0x5b0] sm:$0xff]  ;;  %v466_v34 = vld [vmem:[#allocation8 + $0x100] sm:$0xff] }
  0x84   :  { %847 = vmatpush.msra.mxu0 %v434_v55  ;;  %867 = vmatpush.msra.mxu1 %v530_v56  ;;  %v657_v55 = vld [vmem:[#allocation8 + $0x6f8] sm:$0xff]  ;;  %v262_v56 = vperm.slane %v1863_v52, 0 }
  0x85   :  { %887 = vmatpush.msra.mxu2 %v626_v26  ;;  %907 = vmatpush.msra.mxu3 %v722_v37  ;;  %v490_v26 = vld [vmem:[#allocation8 + $0x1c0] sm:$0xff] }
  0x86   :  { %912 = vmatpush.msrb.mxu0 %v525_v57  ;;  %932 = vmatpush.msrb.mxu1 %v621_v58  ;;  %v765_v57 = vld [vmem:[#allocation8 + $0xa58] sm:$0xff]  ;;  %v651_v58 = vld [vmem:[#allocation8 + $0x6c8] sm:$0xff]  ;;  %v574_v37 = vld [vmem:[#allocation8 + $0x460] sm:$0xff] }
  0x87   :  { %952 = vmatpush.msrb.mxu2 %v717_v30  ;;  %972 = vmatpush.msrb.mxu3 %v813_v40  ;;  %v478_v30 = vld [vmem:[#allocation8 + $0x160] sm:$0xff]  ;;  %v264_v40 = vperm.slane %v1863_v52, 2 }
  0x88   :  { %913 = vmatpush.msrb.mxu0 %v519_v59  ;;  %933 = vmatpush.msrb.mxu1 %v615_v60 }
  0x89   :  { %953 = vmatpush.msrb.mxu2 %v711_v33  ;;  %973 = vmatpush.msrb.mxu3 %v807_v41  ;;  %v586_v33 = vld [vmem:[#allocation8 + $0x4c0] sm:$0xff]  ;;  %v448_v41 = vld [vmem:[#allocation8 + $0x70] sm:$0xff] }
  0x8a   :  { %914 = vmatpush.msrb.mxu0 %v513_v61  ;;  %934 = vmatpush.msrb.mxu1 %v609_v62  ;;  %v645_v61 = vld [vmem:[#allocation8 + $0x698] sm:$0xff]  ;;  %v759_v62 = vld [vmem:[#allocation8 + $0xa28] sm:$0xff] }
  0x8b   :  { %954 = vmatpush.msrb.mxu2 %v705_v36  ;;  %974 = vmatpush.msrb.mxu3 %v801_v43  ;;  %v460_v36 = vld [vmem:[#allocation8 + $0xd0] sm:$0xff] }
  0x8c   :  { %915 = vmatpush.msrb.mxu0 %v507_v0  ;;  %935 = vmatpush.msrb.mxu1 %v603_v1  ;;  %v263_v1 = vperm.slane %v1863_v52, 1 }
  0x8d   :  { %955 = vmatpush.msrb.mxu2 %v699_v39  ;;  %975 = vmatpush.msrb.mxu3 %v795_v45  ;;  %v568_v39 = vld [vmem:[#allocation8 + $0x430] sm:$0xff] }
  0x8e   :  { %916 = vmatpush.msrb.mxu0 %v501_v2  ;;  %936 = vmatpush.msrb.mxu1 %v597_v3  ;;  %v639_v2 = vld [vmem:[#allocation8 + $0x668] sm:$0xff]  ;;  %v753_v3 = vld [vmem:[#allocation8 + $0x9f8] sm:$0xff]  ;;  %v556_v45 = vld [vmem:[#allocation8 + $0x3d0] sm:$0xff] }
  0x8f   :  { %956 = vmatpush.msrb.mxu2 %v693_v42  ;;  %976 = vmatpush.msrb.mxu3 %v789_v47  ;;  %v562_v42 = vld [vmem:[#allocation8 + $0x400] sm:$0xff] }
  0x90   :  { %917 = vmatpush.msrb.mxu0 %v495_v4  ;;  %937 = vmatpush.msrb.mxu1 %v591_v6  ;;  %v633_v6 = vld [vmem:[#allocation8 + $0x638] sm:$0xff] }
  0x91   :  { %957 = vmatpush.msrb.mxu2 %v687_v44  ;;  %977 = vmatpush.msrb.mxu3 %v783_v49  ;;  %v442_v44 = vld [vmem:[#allocation8 + $0x40] sm:$0xff] }
  0x92   :  { %918 = vmatpush.msrb.mxu0 %v489_v7  ;;  %938 = vmatpush.msrb.mxu1 %v585_v8  ;;  %v747_v7 = vld [vmem:[#allocation8 + $0x9c8] sm:$0xff]  ;;  %v550_v49 = vld [vmem:[#allocation8 + $0x3a0] sm:$0xff] }
  0x93   :  { %958 = vmatpush.msrb.mxu2 %v681_v46  ;;  %978 = vmatpush.msrb.mxu3 %v777_v51  ;;  %v265_v51 = vperm.slane %v1863_v52, 3  ;;  %v515_v52 = vld [vmem:[#allocation8 + $0x288] sm:$0xff] }
  0x94   :  { %919 = vmatpush.msrb.mxu0 %v483_v9  ;;  %939 = vmatpush.msrb.mxu1 %v579_v10  ;;  %v526_v10 = vld [vmem:[#allocation8 + $0x2e0] sm:$0xff] }
  0x95   :  { %959 = vmatpush.msrb.mxu2 %v675_v48  ;;  %979 = vmatpush.msrb.mxu3 %v771_v54  ;;  %v436_v48 = vld [vmem:[#allocation8 + $0x10] sm:$0xff] }
  0x96   :  { %920 = vmatpush.msrb.mxu0 %v477_v11  ;;  %940 = vmatpush.msrb.mxu1 %v573_v12  ;;  %v627_v12 = vld [vmem:[#allocation8 + $0x608] sm:$0xff] }
  0x97   :  { %960 = vmatpush.msrb.mxu2 %v669_v50  ;;  %980 = vmatpush.msrb.mxu3 %v765_v57 }
  0x98   :  { %921 = vmatpush.msrb.mxu0 %v471_v13  ;;  %941 = vmatpush.msrb.mxu1 %v567_v18  ;;  %v741_v13 = vld [vmem:[#allocation8 + $0x998] sm:$0xff] }
  0x99   :  { %961 = vmatpush.msrb.mxu2 %v663_v53  ;;  %981 = vmatpush.msrb.mxu3 %v759_v62  ;;  %v527_v53 = vld [vmem:[#allocation8 + $0x2e8] sm:$0xff] }
  0x9a   :  { %922 = vmatpush.msrb.mxu0 %v465_v63  ;;  %942 = vmatpush.msrb.mxu1 %v561_v21  ;;  %v520_v63 = vld [vmem:[#allocation8 + $0x2b0] sm:$0xff]  ;;  %v502_v21 = vld [vmem:[#allocation8 + $0x220] sm:$0xff] }
  0x9b   :  { %962 = vmatpush.msrb.mxu2 %v657_v55  ;;  %982 = vmatpush.msrb.mxu3 %v753_v3  ;;  %v718_v55 = vld [vmem:[#allocation8 + $0x8e0] sm:$0xff] }
  0x9c   :  { %923 = vmatpush.msrb.mxu0 %v459_v14  ;;  %943 = vmatpush.msrb.mxu1 %v555_v25  ;;  %v610_v25 = vld [vmem:[#allocation8 + $0x580] sm:$0xff] }
  0x9d   :  { %963 = vmatpush.msrb.mxu2 %v651_v58  ;;  %983 = vmatpush.msrb.mxu3 %v747_v7  ;;  %v521_v58 = vld [vmem:[#allocation8 + $0x2b8] sm:$0xff] }
  0x9e   :  { %924 = vmatpush.msrb.mxu0 %v453_v17  ;;  %944 = vmatpush.msrb.mxu1 %v549_v29  ;;  %v735_v17 = vld [vmem:[#allocation8 + $0x968] sm:$0xff]  ;;  %v598_v29 = vld [vmem:[#allocation8 + $0x520] sm:$0xff]  ;;  %v509_v7 = vld [vmem:[#allocation8 + $0x258] sm:$0xff] }
  0x9f   :  { %964 = vmatpush.msrb.mxu2 %v645_v61  ;;  %984 = vmatpush.msrb.mxu3 %v741_v13  ;;  %v538_v61 = vld [vmem:[#allocation8 + $0x340] sm:$0xff]  ;;  %v617_v13 = vld [vmem:[#allocation8 + $0x5b8] sm:$0xff] }
  0xa0   :  { %925 = vmatpush.msrb.mxu0 %v447_v20  ;;  %945 = vmatpush.msrb.mxu1 %v543_v32  ;;  %v729_v20 = vld [vmem:[#allocation8 + $0x938] sm:$0xff]  ;;  %v472_v32 = vld [vmem:[#allocation8 + $0x130] sm:$0xff] }
  0xa1   :  { %965 = vmatpush.msrb.mxu2 %v639_v2  ;;  %985 = vmatpush.msrb.mxu3 %v735_v17  ;;  %v532_v2 = vld [vmem:[#allocation8 + $0x310] sm:$0xff] }
  0xa2   :  { %926 = vmatpush.msrb.mxu0 %v441_v24  ;;  %946 = vmatpush.msrb.mxu1 %v537_v35  ;;  %v496_v24 = vld [vmem:[#allocation8 + $0x1f0] sm:$0xff] }
  0xa3   :  { %966 = vmatpush.msrb.mxu2 %v633_v6  ;;  %986 = vmatpush.msrb.mxu3 %v729_v20  ;;  %v580_v35 = vld [vmem:[#allocation8 + $0x490] sm:$0xff]  ;;  %v814_v6 = vld [vmem:[#allocation8 + $0xbe0] sm:$0xff]  ;;  %v605_v20 = vld [vmem:[#allocation8 + $0x558] sm:$0xff] }
  0xa4   :  { %927 = vmatpush.msrb.mxu0 %v435_v28  ;;  %947 = vmatpush.msrb.mxu1 %v531_v38  ;;  %v484_v28 = vld [vmem:[#allocation8 + $0x190] sm:$0xff]  ;;  %v454_v38 = vld [vmem:[#allocation8 + $0xa0] sm:$0xff] }
  0xa5   :  { %967 = vmatpush.msrb.mxu2 %v627_v12  ;;  %987 = vmatpush.msrb.mxu3 %v723_v23  ;;  %v503_v12 = vld [vmem:[#allocation8 + $0x228] sm:$0xff]  ;;  %v796_v17 = vld [vmem:[#allocation8 + $0xb50] sm:$0xff]  ;;  %v485_v23 = vld [vmem:[#allocation8 + $0x198] sm:$0xff] }
  0xbe   :  { %v287_v59 = vpop.f32.mrf.mxu0 }
  0xbf   :  { %v288_v60 = vadd.f32 %v287_v59, %v262_v56  ;;  %v544_v56 = vld [vmem:[#allocation8 + $0x370] sm:$0xff] }
  0xc1   :  { %v307_v0 = vpop.f32.mrf.mxu1 }
  0xc2   :  { %v308_v4 = vadd.f32 %v307_v0, %v288_v60  ;;  %v712_v60 = vld [vmem:[#allocation8 + $0x8b0] sm:$0xff] }
  0xc4   :  { %v1867_v8 = vmax.f32 %v308_v4, 0.0  ;;  %v327_v9 = vpop.f32.mrf.mxu2  ;;  %v700_v4 = vld [vmem:[#allocation8 + $0x850] sm:$0xff] }
  0xc5   :  { %v328_v11 = vadd.f32 %v327_v9, %v263_v1  ;;  %v706_v1 = vld [vmem:[#allocation8 + $0x880] sm:$0xff]  ;;  %v623_v9 = vld [vmem:[#allocation8 + $0x5e8] sm:$0xff] }
  0xc6   :  { %848 = vmatmul.f32.vlgmr.msra.gmra.mxu0 %v1867_v8 }
  0xc7   :  { %992 = vmatpush.msra.mxu0 %v526_v10  ;;  %v347_v14 = vpop.f32.mrf.mxu3  ;;  %v808_v10 = vld [vmem:[#allocation8 + $0xbb0] sm:$0xff] }
  0xc8   :  { %v348_v15 = vadd.f32 %v347_v14, %v328_v11  ;;  %v694_v11 = vld [vmem:[#allocation8 + $0x820] sm:$0xff]  ;;  %v688_v14 = vld [vmem:[#allocation8 + $0x7f0] sm:$0xff] }
  0xc9   :  { %993 = vmatpush.msra.mxu0 %v520_v63  ;;  %v802_v63 = vld [vmem:[#allocation8 + $0xb80] sm:$0xff] }
  0xca   :  { %v1870_v18 = vmax.f32 %v348_v15, 0.0  ;;  %v497_v15 = vld [vmem:[#allocation8 + $0x1f8] sm:$0xff] }
  0xcb   :  { %994 = vmatpush.msra.mxu0 %v514_v16  ;;  %v611_v16 = vld [vmem:[#allocation8 + $0x588] sm:$0xff] }
  0xcc   :  { %868 = vmatmul.f32.vlgmr.msra.gmra.mxu1 %v1870_v18 }
  0xcd   :  { %995 = vmatpush.msra.mxu0 %v508_v5  ;;  %1012 = vmatpush.msra.mxu1 %v622_v19  ;;  %v682_v5 = vld [vmem:[#allocation8 + $0x7c0] sm:$0xff]  ;;  %v491_v19 = vld [vmem:[#allocation8 + $0x1c8] sm:$0xff] }
  0xce   :  { %928 = vmatmul.f32.vlgmr.msrb.gmra.mxu0 %v1867_v8 }
  0xcf   :  { %996 = vmatpush.msra.mxu0 %v502_v21  ;;  %1013 = vmatpush.msra.mxu1 %v616_v22  ;;  %v676_v21 = vld [vmem:[#allocation8 + $0x790] sm:$0xff]  ;;  %v790_v22 = vld [vmem:[#allocation8 + $0xb20] sm:$0xff] }
  0xd1   :  { %997 = vmatpush.msra.mxu0 %v496_v24  ;;  %1014 = vmatpush.msra.mxu1 %v610_v25  ;;  %v599_v24 = vld [vmem:[#allocation8 + $0x528] sm:$0xff]  ;;  %v670_v25 = vld [vmem:[#allocation8 + $0x760] sm:$0xff] }
  0xd3   :  { %998 = vmatpush.msra.mxu0 %v490_v26  ;;  %1015 = vmatpush.msra.mxu1 %v604_v27  ;;  %v784_v26 = vld [vmem:[#allocation8 + $0xaf0] sm:$0xff]  ;;  %v479_v27 = vld [vmem:[#allocation8 + $0x168] sm:$0xff] }
  0xd4   :  { %948 = vmatmul.f32.vlgmr.msrb.gmra.mxu1 %v1870_v18 }
  0xd5   :  { %999 = vmatpush.msra.mxu0 %v484_v28  ;;  %1016 = vmatpush.msra.mxu1 %v598_v29  ;;  %v593_v28 = vld [vmem:[#allocation8 + $0x4f8] sm:$0xff]  ;;  %v664_v29 = vld [vmem:[#allocation8 + $0x730] sm:$0xff] }
  0xd7   :  { %1000 = vmatpush.msra.mxu0 %v478_v30  ;;  %1017 = vmatpush.msra.mxu1 %v592_v31  ;;  %v778_v30 = vld [vmem:[#allocation8 + $0xac0] sm:$0xff]  ;;  %v473_v31 = vld [vmem:[#allocation8 + $0x138] sm:$0xff] }
  0xd9   :  { %1001 = vmatpush.msra.mxu0 %v472_v32  ;;  %1018 = vmatpush.msra.mxu1 %v586_v33  ;;  %v587_v32 = vld [vmem:[#allocation8 + $0x4c8] sm:$0xff]  ;;  %v658_v33 = vld [vmem:[#allocation8 + $0x700] sm:$0xff] }
  0xdb   :  { %1002 = vmatpush.msra.mxu0 %v466_v34  ;;  %1019 = vmatpush.msra.mxu1 %v580_v35  ;;  %v772_v34 = vld [vmem:[#allocation8 + $0xa90] sm:$0xff]  ;;  %v467_v35 = vld [vmem:[#allocation8 + $0x108] sm:$0xff] }
  0xdd   :  { %1003 = vmatpush.msra.mxu0 %v460_v36  ;;  %1020 = vmatpush.msra.mxu1 %v574_v37  ;;  %v581_v36 = vld [vmem:[#allocation8 + $0x498] sm:$0xff]  ;;  %v652_v37 = vld [vmem:[#allocation8 + $0x6d0] sm:$0xff] }
  0xdf   :  { %1004 = vmatpush.msra.mxu0 %v454_v38  ;;  %1021 = vmatpush.msra.mxu1 %v568_v39  ;;  %v766_v38 = vld [vmem:[#allocation8 + $0xa60] sm:$0xff]  ;;  %v461_v39 = vld [vmem:[#allocation8 + $0xd8] sm:$0xff] }
  0xe0   :  { %v367_v43 = vpop.f32.mrf.mxu0 }
  0xe1   :  { %v368_v46 = vadd.f32 %v367_v43, %v264_v40  ;;  %1005 = vmatpush.msra.mxu0 %v448_v41  ;;  %1022 = vmatpush.msra.mxu1 %v562_v42  ;;  %v575_v40 = vld [vmem:[#allocation8 + $0x468] sm:$0xff]  ;;  %v646_v41 = vld [vmem:[#allocation8 + $0x6a0] sm:$0xff]  ;;  %v760_v42 = vld [vmem:[#allocation8 + $0xa30] sm:$0xff] }
  0xe2   :  { %v387_v47 = vpop.f32.mrf.mxu1  ;;  %v455_v43 = vld [vmem:[#allocation8 + $0xa8] sm:$0xff] }
  0xe3   :  { %v388_v50 = vadd.f32 %v387_v47, %v368_v46  ;;  %1006 = vmatpush.msra.mxu0 %v442_v44  ;;  %1023 = vmatpush.msra.mxu1 %v556_v45  ;;  %v569_v44 = vld [vmem:[#allocation8 + $0x438] sm:$0xff]  ;;  %v640_v45 = vld [vmem:[#allocation8 + $0x670] sm:$0xff]  ;;  %v754_v46 = vld [vmem:[#allocation8 + $0xa00] sm:$0xff] }
  0xe4   :  { %v449_v47 = vld [vmem:[#allocation8 + $0x78] sm:$0xff] }
  0xe5   :  { %v1877_v54 = vmax.f32 %v388_v50, 0.0  ;;  %1007 = vmatpush.msra.mxu0 %v436_v48  ;;  %1024 = vmatpush.msra.mxu1 %v550_v49  ;;  %v563_v48 = vld [vmem:[#allocation8 + $0x408] sm:$0xff]  ;;  %v634_v49 = vld [vmem:[#allocation8 + $0x640] sm:$0xff]  ;;  %v748_v50 = vld [vmem:[#allocation8 + $0x9d0] sm:$0xff] }
  0xe6   :  { %v407_v57 = vpop.f32.mrf.mxu2  ;;  %1008 = vmatmul.f32.vlgmr.msra.gmra.mxu0 %v1867_v8 }
  0xe7   :  { %v408_v59 = vadd.f32 %v407_v57, %v265_v51  ;;  %888 = vmatmul.f32.vlgmr.msra.gmra.mxu2 %v1877_v54  ;;  %1072 = vmatpush.msrb.mxu0 %v527_v53  ;;  %v443_v51 = vld [vmem:[#allocation8 + $0x48] sm:$0xff]  ;;  %v557_v53 = vld [vmem:[#allocation8 + $0x3d8] sm:$0xff] }
  0xe8   :  { %1032 = vmatpush.msra.mxu2 %v718_v55  ;;  %v427_v62 = vpop.f32.mrf.mxu3  ;;  %1025 = vmatpush.msra.mxu1 %v544_v56  ;;  %v628_v55 = vld [vmem:[#allocation8 + $0x610] sm:$0xff]  ;;  %v742_v56 = vld [vmem:[#allocation8 + $0x9a0] sm:$0xff]  ;;  %v437_v57 = vld [vmem:[#allocation8 + $0x18] sm:$0xff] }
  0xe9   :  { %v428_v0 = vadd.f32 %v427_v62, %v408_v59  ;;  %1073 = vmatpush.msrb.mxu0 %v521_v58  ;;  %v551_v58 = vld [vmem:[#allocation8 + $0x3a8] sm:$0xff]  ;;  %v545_v62 = vld [vmem:[#allocation8 + $0x378] sm:$0xff] }
  0xea   :  { %1033 = vmatpush.msra.mxu2 %v712_v60  ;;  %1026 = vmatpush.msra.mxu1 %v538_v61  ;;  %v719_v59 = vld [vmem:[#allocation8 + $0x8e8] sm:$0xff]  ;;  %v528_v60 = vld [vmem:[#allocation8 + $0x2f0] sm:$0xff] }
  0xeb   :  { %v1881_v3 = vmax.f32 %v428_v0, 0.0  ;;  %1074 = vmatpush.msrb.mxu0 %v515_v52  ;;  %v736_v61 = vld [vmem:[#allocation8 + $0x970] sm:$0xff]  ;;  %v713_v52 = vld [vmem:[#allocation8 + $0x8b8] sm:$0xff]  ;;  %v522_v0 = vld [vmem:[#allocation8 + $0x2c0] sm:$0xff] }
  0xec   :  { %1034 = vmatpush.msra.mxu2 %v706_v1  ;;  %1027 = vmatpush.msra.mxu1 %v532_v2  ;;  %v730_v1 = vld [vmem:[#allocation8 + $0x940] sm:$0xff]  ;;  %v539_v2 = vld [vmem:[#allocation8 + $0x348] sm:$0xff] }
  0xed   :  { %908 = vmatmul.f32.vlgmr.msra.gmra.mxu3 %v1881_v3  ;;  %1028 = vmatmul.f32.vlgmr.msra.gmra.mxu1 %v1870_v18 }
  0xee   :  { %1035 = vmatpush.msra.mxu2 %v700_v4  ;;  %1052 = vmatpush.msra.mxu3 %v814_v6  ;;  %v707_v4 = vld [vmem:[#allocation8 + $0x888] sm:$0xff]  ;;  %v516_v6 = vld [vmem:[#allocation8 + $0x290] sm:$0xff] }
  0xef   :  { %1075 = vmatpush.msrb.mxu0 %v509_v7  ;;  %1092 = vmatpush.msrb.mxu1 %v623_v9  ;;  %v724_v7 = vld [vmem:[#allocation8 + $0x910] sm:$0xff]  ;;  %v533_v9 = vld [vmem:[#allocation8 + $0x318] sm:$0xff] }
  0xf0   :  { %968 = vmatmul.f32.vlgmr.msrb.gmra.mxu2 %v1877_v54  ;;  %1053 = vmatpush.msra.mxu3 %v808_v10  ;;  %v701_v10 = vld [vmem:[#allocation8 + $0x858] sm:$0xff] }
  0xf1   :  { %1036 = vmatpush.msra.mxu2 %v694_v11  ;;  %1076 = vmatpush.msrb.mxu0 %v503_v12  ;;  %v815_v11 = vld [vmem:[#allocation8 + $0xbe8] sm:$0xff]  ;;  %v510_v12 = vld [vmem:[#allocation8 + $0x260] sm:$0xff] }
  0xf2   :  { %1093 = vmatpush.msrb.mxu1 %v617_v13  ;;  %1054 = vmatpush.msra.mxu3 %v802_v63  ;;  %v624_v13 = vld [vmem:[#allocation8 + $0x5f0] sm:$0xff]  ;;  %v695_v63 = vld [vmem:[#allocation8 + $0x828] sm:$0xff] }
  0xf3   :  { %1037 = vmatpush.msra.mxu2 %v688_v14  ;;  %1077 = vmatpush.msrb.mxu0 %v497_v15  ;;  %v809_v14 = vld [vmem:[#allocation8 + $0xbb8] sm:$0xff]  ;;  %v504_v15 = vld [vmem:[#allocation8 + $0x230] sm:$0xff] }
  0xf4   :  { %1094 = vmatpush.msrb.mxu1 %v611_v16  ;;  %1055 = vmatpush.msra.mxu3 %v796_v17  ;;  %v618_v16 = vld [vmem:[#allocation8 + $0x5c0] sm:$0xff]  ;;  %v689_v17 = vld [vmem:[#allocation8 + $0x7f8] sm:$0xff] }
  0xf5   :  { %1038 = vmatpush.msra.mxu2 %v682_v5  ;;  %1078 = vmatpush.msrb.mxu0 %v491_v19  ;;  %v803_v5 = vld [vmem:[#allocation8 + $0xb88] sm:$0xff]  ;;  %v498_v19 = vld [vmem:[#allocation8 + $0x200] sm:$0xff] }
  0xf6   :  { %1095 = vmatpush.msrb.mxu1 %v605_v20  ;;  %988 = vmatmul.f32.vlgmr.msrb.gmra.mxu3 %v1881_v3  ;;  %v612_v20 = vld [vmem:[#allocation8 + $0x590] sm:$0xff] }
  0xf7   :  { %1039 = vmatpush.msra.mxu2 %v676_v21  ;;  %1056 = vmatpush.msra.mxu3 %v790_v22  ;;  %v683_v21 = vld [vmem:[#allocation8 + $0x7c8] sm:$0xff]  ;;  %v797_v22 = vld [vmem:[#allocation8 + $0xb58] sm:$0xff] }
  0xf8   :  { %1079 = vmatpush.msrb.mxu0 %v485_v23  ;;  %1096 = vmatpush.msrb.mxu1 %v599_v24  ;;  %v492_v23 = vld [vmem:[#allocation8 + $0x1d0] sm:$0xff]  ;;  %v606_v24 = vld [vmem:[#allocation8 + $0x560] sm:$0xff] }
  0xf9   :  { %1040 = vmatpush.msra.mxu2 %v670_v25  ;;  %1057 = vmatpush.msra.mxu3 %v784_v26  ;;  %v677_v25 = vld [vmem:[#allocation8 + $0x798] sm:$0xff]  ;;  %v791_v26 = vld [vmem:[#allocation8 + $0xb28] sm:$0xff] }
  0xfa   :  { %1080 = vmatpush.msrb.mxu0 %v479_v27  ;;  %1097 = vmatpush.msrb.mxu1 %v593_v28  ;;  %v486_v27 = vld [vmem:[#allocation8 + $0x1a0] sm:$0xff]  ;;  %v600_v28 = vld [vmem:[#allocation8 + $0x530] sm:$0xff] }
  0xfb   :  { %1041 = vmatpush.msra.mxu2 %v664_v29  ;;  %1058 = vmatpush.msra.mxu3 %v778_v30  ;;  %v671_v29 = vld [vmem:[#allocation8 + $0x768] sm:$0xff]  ;;  %v785_v30 = vld [vmem:[#allocation8 + $0xaf8] sm:$0xff] }
  0xfc   :  { %1081 = vmatpush.msrb.mxu0 %v473_v31  ;;  %1098 = vmatpush.msrb.mxu1 %v587_v32  ;;  %v480_v31 = vld [vmem:[#allocation8 + $0x170] sm:$0xff]  ;;  %v594_v32 = vld [vmem:[#allocation8 + $0x500] sm:$0xff] }
  0xfd   :  { %1042 = vmatpush.msra.mxu2 %v658_v33  ;;  %1059 = vmatpush.msra.mxu3 %v772_v34  ;;  %v665_v33 = vld [vmem:[#allocation8 + $0x738] sm:$0xff]  ;;  %v779_v34 = vld [vmem:[#allocation8 + $0xac8] sm:$0xff] }
  0xfe   :  { %1082 = vmatpush.msrb.mxu0 %v467_v35  ;;  %1099 = vmatpush.msrb.mxu1 %v581_v36  ;;  %v474_v35 = vld [vmem:[#allocation8 + $0x140] sm:$0xff]  ;;  %v588_v36 = vld [vmem:[#allocation8 + $0x4d0] sm:$0xff] }
  0xff   :  { %1043 = vmatpush.msra.mxu2 %v652_v37  ;;  %1060 = vmatpush.msra.mxu3 %v766_v38  ;;  %v659_v37 = vld [vmem:[#allocation8 + $0x708] sm:$0xff]  ;;  %v773_v38 = vld [vmem:[#allocation8 + $0xa98] sm:$0xff] }
 0x100   :  { %1083 = vmatpush.msrb.mxu0 %v461_v39  ;;  %1100 = vmatpush.msrb.mxu1 %v575_v40  ;;  %v468_v39 = vld [vmem:[#allocation8 + $0x110] sm:$0xff]  ;;  %v582_v40 = vld [vmem:[#allocation8 + $0x4a0] sm:$0xff] }
 0x101   :  { %1044 = vmatpush.msra.mxu2 %v646_v41  ;;  %1061 = vmatpush.msra.mxu3 %v760_v42  ;;  %v653_v41 = vld [vmem:[#allocation8 + $0x6d8] sm:$0xff]  ;;  %v767_v42 = vld [vmem:[#allocation8 + $0xa68] sm:$0xff] }
 0x102   :  { %1084 = vmatpush.msrb.mxu0 %v455_v43  ;;  %1101 = vmatpush.msrb.mxu1 %v569_v44  ;;  %v462_v43 = vld [vmem:[#allocation8 + $0xe0] sm:$0xff]  ;;  %v576_v44 = vld [vmem:[#allocation8 + $0x470] sm:$0xff] }
 0x103   :  { %1045 = vmatpush.msra.mxu2 %v640_v45  ;;  %1062 = vmatpush.msra.mxu3 %v754_v46  ;;  %v647_v45 = vld [vmem:[#allocation8 + $0x6a8] sm:$0xff]  ;;  %v761_v46 = vld [vmem:[#allocation8 + $0xa38] sm:$0xff] }
 0x104   :  { %1085 = vmatpush.msrb.mxu0 %v449_v47  ;;  %1102 = vmatpush.msrb.mxu1 %v563_v48  ;;  %v456_v47 = vld [vmem:[#allocation8 + $0xb0] sm:$0xff]  ;;  %v570_v48 = vld [vmem:[#allocation8 + $0x440] sm:$0xff] }
 0x105   :  { %1046 = vmatpush.msra.mxu2 %v634_v49  ;;  %1063 = vmatpush.msra.mxu3 %v748_v50  ;;  %v641_v49 = vld [vmem:[#allocation8 + $0x678] sm:$0xff]  ;;  %v755_v50 = vld [vmem:[#allocation8 + $0xa08] sm:$0xff] }
 0x106   :  { %1086 = vmatpush.msrb.mxu0 %v443_v51  ;;  %1103 = vmatpush.msrb.mxu1 %v557_v53  ;;  %v450_v51 = vld [vmem:[#allocation8 + $0x80] sm:$0xff]  ;;  %v564_v53 = vld [vmem:[#allocation8 + $0x410] sm:$0xff] }
 0x107   :  { %1047 = vmatpush.msra.mxu2 %v628_v55  ;;  %1064 = vmatpush.msra.mxu3 %v742_v56  ;;  %v635_v55 = vld [vmem:[#allocation8 + $0x648] sm:$0xff]  ;;  %v749_v56 = vld [vmem:[#allocation8 + $0x9d8] sm:$0xff] }
 0x108   :  { %1087 = vmatpush.msrb.mxu0 %v437_v57  ;;  %1104 = vmatpush.msrb.mxu1 %v551_v58  ;;  %v444_v57 = vld [vmem:[#allocation8 + $0x50] sm:$0xff]  ;;  %v558_v58 = vld [vmem:[#allocation8 + $0x3e0] sm:$0xff] }
 0x109   :  { %1048 = vmatmul.f32.vlgmr.msra.gmra.mxu2 %v1877_v54  ;;  %1088 = vmatmul.f32.vlgmr.msrb.gmra.mxu0 %v1867_v8 }
 0x10a   :  { %1112 = vmatpush.msrb.mxu2 %v719_v59  ;;  %1152 = vmatpush.msra.mxu0 %v528_v60  ;;  %v629_v59 = vld [vmem:[#allocation8 + $0x618] sm:$0xff]  ;;  %v743_v60 = vld [vmem:[#allocation8 + $0x9a8] sm:$0xff] }
 0x10b   :  { %1065 = vmatpush.msra.mxu3 %v736_v61  ;;  %1105 = vmatpush.msrb.mxu1 %v545_v62  ;;  %v438_v61 = vld [vmem:[#allocation8 + $0x20] sm:$0xff]  ;;  %v552_v62 = vld [vmem:[#allocation8 + $0x3b0] sm:$0xff] }
 0x10c   :  { %1113 = vmatpush.msrb.mxu2 %v713_v52  ;;  %1153 = vmatpush.msra.mxu0 %v522_v0  ;;  %v720_v52 = vld [vmem:[#allocation8 + $0x8f0] sm:$0xff]  ;;  %v529_v0 = vld [vmem:[#allocation8 + $0x2f8] sm:$0xff] }
 0x10d   :  { %1066 = vmatpush.msra.mxu3 %v730_v1  ;;  %1106 = vmatpush.msrb.mxu1 %v539_v2  ;;  %v737_v1 = vld [vmem:[#allocation8 + $0x978] sm:$0xff]  ;;  %v546_v2 = vld [vmem:[#allocation8 + $0x380] sm:$0xff] }
 0x10e   :  { %1114 = vmatpush.msrb.mxu2 %v707_v4  ;;  %1154 = vmatpush.msra.mxu0 %v516_v6  ;;  %v714_v4 = vld [vmem:[#allocation8 + $0x8c0] sm:$0xff]  ;;  %v523_v6 = vld [vmem:[#allocation8 + $0x2c8] sm:$0xff] }
 0x10f   :  { %1067 = vmatpush.msra.mxu3 %v724_v7  ;;  %1107 = vmatpush.msrb.mxu1 %v533_v9  ;;  %v731_v7 = vld [vmem:[#allocation8 + $0x948] sm:$0xff]  ;;  %v540_v9 = vld [vmem:[#allocation8 + $0x350] sm:$0xff] }
 0x110   :  { %1068 = vmatmul.f32.vlgmr.msra.gmra.mxu3 %v1881_v3  ;;  %1108 = vmatmul.f32.vlgmr.msrb.gmra.mxu1 %v1870_v18 }
 0x111   :  { %1115 = vmatpush.msrb.mxu2 %v701_v10  ;;  %1132 = vmatpush.msrb.mxu3 %v815_v11  ;;  %v708_v10 = vld [vmem:[#allocation8 + $0x890] sm:$0xff]  ;;  %v517_v11 = vld [vmem:[#allocation8 + $0x298] sm:$0xff] }
 0x112   :  { %1155 = vmatpush.msra.mxu0 %v510_v12  ;;  %1172 = vmatpush.msra.mxu1 %v624_v13  ;;  %v725_v12 = vld [vmem:[#allocation8 + $0x918] sm:$0xff]  ;;  %v534_v13 = vld [vmem:[#allocation8 + $0x320] sm:$0xff] }
 0x113   :  { %1116 = vmatpush.msrb.mxu2 %v695_v63  ;;  %1133 = vmatpush.msrb.mxu3 %v809_v14  ;;  %v702_v63 = vld [vmem:[#allocation8 + $0x860] sm:$0xff]  ;;  %v816_v14 = vld [vmem:[#allocation8 + $0xbf0] sm:$0xff] }
 0x114   :  { %1156 = vmatpush.msra.mxu0 %v504_v15  ;;  %1173 = vmatpush.msra.mxu1 %v618_v16  ;;  %v511_v15 = vld [vmem:[#allocation8 + $0x268] sm:$0xff]  ;;  %v625_v16 = vld [vmem:[#allocation8 + $0x5f8] sm:$0xff] }
 0x115   :  { %1117 = vmatpush.msrb.mxu2 %v689_v17  ;;  %1134 = vmatpush.msrb.mxu3 %v803_v5  ;;  %v696_v17 = vld [vmem:[#allocation8 + $0x830] sm:$0xff]  ;;  %v810_v5 = vld [vmem:[#allocation8 + $0xbc0] sm:$0xff] }
 0x116   :  { %1157 = vmatpush.msra.mxu0 %v498_v19  ;;  %1174 = vmatpush.msra.mxu1 %v612_v20  ;;  %v505_v19 = vld [vmem:[#allocation8 + $0x238] sm:$0xff]  ;;  %v619_v20 = vld [vmem:[#allocation8 + $0x5c8] sm:$0xff] }
 0x117   :  { %1118 = vmatpush.msrb.mxu2 %v683_v21  ;;  %1135 = vmatpush.msrb.mxu3 %v797_v22  ;;  %v690_v21 = vld [vmem:[#allocation8 + $0x800] sm:$0xff]  ;;  %v804_v22 = vld [vmem:[#allocation8 + $0xb90] sm:$0xff] }
 0x118   :  { %1158 = vmatpush.msra.mxu0 %v492_v23  ;;  %1175 = vmatpush.msra.mxu1 %v606_v24  ;;  %v499_v23 = vld [vmem:[#allocation8 + $0x208] sm:$0xff]  ;;  %v613_v24 = vld [vmem:[#allocation8 + $0x598] sm:$0xff] }
 0x119   :  { %1119 = vmatpush.msrb.mxu2 %v677_v25  ;;  %1136 = vmatpush.msrb.mxu3 %v791_v26  ;;  %v684_v25 = vld [vmem:[#allocation8 + $0x7d0] sm:$0xff]  ;;  %v798_v26 = vld [vmem:[#allocation8 + $0xb60] sm:$0xff] }
 0x11a   :  { %1159 = vmatpush.msra.mxu0 %v486_v27  ;;  %1176 = vmatpush.msra.mxu1 %v600_v28  ;;  %v493_v27 = vld [vmem:[#allocation8 + $0x1d8] sm:$0xff]  ;;  %v607_v28 = vld [vmem:[#allocation8 + $0x568] sm:$0xff] }
 0x11b   :  { %1120 = vmatpush.msrb.mxu2 %v671_v29  ;;  %1137 = vmatpush.msrb.mxu3 %v785_v30  ;;  %v678_v29 = vld [vmem:[#allocation8 + $0x7a0] sm:$0xff]  ;;  %v792_v30 = vld [vmem:[#allocation8 + $0xb30] sm:$0xff] }
 0x11c   :  { %1160 = vmatpush.msra.mxu0 %v480_v31  ;;  %1177 = vmatpush.msra.mxu1 %v594_v32  ;;  %v487_v31 = vld [vmem:[#allocation8 + $0x1a8] sm:$0xff]  ;;  %v601_v32 = vld [vmem:[#allocation8 + $0x538] sm:$0xff] }
 0x11d   :  { %1121 = vmatpush.msrb.mxu2 %v665_v33  ;;  %1138 = vmatpush.msrb.mxu3 %v779_v34  ;;  %v672_v33 = vld [vmem:[#allocation8 + $0x770] sm:$0xff]  ;;  %v786_v34 = vld [vmem:[#allocation8 + $0xb00] sm:$0xff] }
 0x11e   :  { %1161 = vmatpush.msra.mxu0 %v474_v35  ;;  %1178 = vmatpush.msra.mxu1 %v588_v36  ;;  %v481_v35 = vld [vmem:[#allocation8 + $0x178] sm:$0xff]  ;;  %v595_v36 = vld [vmem:[#allocation8 + $0x508] sm:$0xff] }
 0x11f   :  { %1122 = vmatpush.msrb.mxu2 %v659_v37  ;;  %1139 = vmatpush.msrb.mxu3 %v773_v38  ;;  %v666_v37 = vld [vmem:[#allocation8 + $0x740] sm:$0xff]  ;;  %v780_v38 = vld [vmem:[#allocation8 + $0xad0] sm:$0xff] }
 0x120   :  { %1162 = vmatpush.msra.mxu0 %v468_v39  ;;  %1179 = vmatpush.msra.mxu1 %v582_v40  ;;  %v475_v39 = vld [vmem:[#allocation8 + $0x148] sm:$0xff]  ;;  %v589_v40 = vld [vmem:[#allocation8 + $0x4d8] sm:$0xff] }
 0x121   :  { %1123 = vmatpush.msrb.mxu2 %v653_v41  ;;  %1140 = vmatpush.msrb.mxu3 %v767_v42  ;;  %v660_v41 = vld [vmem:[#allocation8 + $0x710] sm:$0xff]  ;;  %v774_v42 = vld [vmem:[#allocation8 + $0xaa0] sm:$0xff] }
 0x122   :  { %1163 = vmatpush.msra.mxu0 %v462_v43  ;;  %1180 = vmatpush.msra.mxu1 %v576_v44  ;;  %v469_v43 = vld [vmem:[#allocation8 + $0x118] sm:$0xff]  ;;  %v583_v44 = vld [vmem:[#allocation8 + $0x4a8] sm:$0xff] }
 0x123   :  { %1124 = vmatpush.msrb.mxu2 %v647_v45  ;;  %1141 = vmatpush.msrb.mxu3 %v761_v46  ;;  %v654_v45 = vld [vmem:[#allocation8 + $0x6e0] sm:$0xff]  ;;  %v768_v46 = vld [vmem:[#allocation8 + $0xa70] sm:$0xff] }
 0x124   :  { %1164 = vmatpush.msra.mxu0 %v456_v47  ;;  %1181 = vmatpush.msra.mxu1 %v570_v48  ;;  %v463_v47 = vld [vmem:[#allocation8 + $0xe8] sm:$0xff]  ;;  %v577_v48 = vld [vmem:[#allocation8 + $0x478] sm:$0xff] }
 0x125   :  { %1125 = vmatpush.msrb.mxu2 %v641_v49  ;;  %1142 = vmatpush.msrb.mxu3 %v755_v50  ;;  %v648_v49 = vld [vmem:[#allocation8 + $0x6b0] sm:$0xff]  ;;  %v762_v50 = vld [vmem:[#allocation8 + $0xa40] sm:$0xff] }
 0x126   :  { %1165 = vmatpush.msra.mxu0 %v450_v51  ;;  %1182 = vmatpush.msra.mxu1 %v564_v53  ;;  %v457_v51 = vld [vmem:[#allocation8 + $0xb8] sm:$0xff]  ;;  %v571_v53 = vld [vmem:[#allocation8 + $0x448] sm:$0xff] }
 0x127   :  { %1126 = vmatpush.msrb.mxu2 %v635_v55  ;;  %1143 = vmatpush.msrb.mxu3 %v749_v56  ;;  %v642_v55 = vld [vmem:[#allocation8 + $0x680] sm:$0xff]  ;;  %v756_v56 = vld [vmem:[#allocation8 + $0xa10] sm:$0xff] }
 0x128   :  { %1166 = vmatpush.msra.mxu0 %v444_v57  ;;  %1183 = vmatpush.msra.mxu1 %v558_v58  ;;  %v451_v57 = vld [vmem:[#allocation8 + $0x88] sm:$0xff]  ;;  %v565_v58 = vld [vmem:[#allocation8 + $0x418] sm:$0xff] }
 0x129   :  { %1127 = vmatpush.msrb.mxu2 %v629_v59  ;;  %1144 = vmatpush.msrb.mxu3 %v743_v60  ;;  %v636_v59 = vld [vmem:[#allocation8 + $0x650] sm:$0xff]  ;;  %v750_v60 = vld [vmem:[#allocation8 + $0x9e0] sm:$0xff] }
 0x12a   :  { %1167 = vmatpush.msra.mxu0 %v438_v61  ;;  %1184 = vmatpush.msra.mxu1 %v552_v62  ;;  %v445_v61 = vld [vmem:[#allocation8 + $0x58] sm:$0xff]  ;;  %v559_v62 = vld [vmem:[#allocation8 + $0x3e8] sm:$0xff] }
 0x12b   :  { %1128 = vmatmul.f32.vlgmr.msrb.gmra.mxu2 %v1877_v54  ;;  %1168 = vmatmul.f32.vlgmr.msra.gmra.mxu0 %v1867_v8 }
 0x12c   :  { %1192 = vmatpush.msra.mxu2 %v720_v52  ;;  %1232 = vmatpush.msrb.mxu0 %v529_v0  ;;  %v630_v52 = vld [vmem:[#allocation8 + $0x620] sm:$0xff]  ;;  %v744_v0 = vld [vmem:[#allocation8 + $0x9b0] sm:$0xff] }
 0x12d   :  { %1145 = vmatpush.msrb.mxu3 %v737_v1  ;;  %1185 = vmatpush.msra.mxu1 %v546_v2  ;;  %v439_v1 = vld [vmem:[#allocation8 + $0x28] sm:$0xff]  ;;  %v553_v2 = vld [vmem:[#allocation8 + $0x3b8] sm:$0xff] }
 0x12e   :  { %1193 = vmatpush.msra.mxu2 %v714_v4  ;;  %1233 = vmatpush.msrb.mxu0 %v523_v6  ;;  %v721_v4 = vld [vmem:[#allocation8 + $0x8f8] sm:$0xff]  ;;  %v738_v6 = vld [vmem:[#allocation8 + $0x980] sm:$0xff] }
 0x12f   :  { %1146 = vmatpush.msrb.mxu3 %v731_v7  ;;  %1186 = vmatpush.msra.mxu1 %v540_v9  ;;  %v547_v7 = vld [vmem:[#allocation8 + $0x388] sm:$0xff]  ;;  %v1333_v9 = vld [vmem:[#allocation11 + $0x78] sm:$0xff] }
 0x130   :  { %1194 = vmatpush.msra.mxu2 %v708_v10  ;;  %1234 = vmatpush.msrb.mxu0 %v517_v11  ;;  %v715_v10 = vld [vmem:[#allocation8 + $0x8c8] sm:$0xff]  ;;  %v732_v11 = vld [vmem:[#allocation8 + $0x950] sm:$0xff] }
 0x131   :  { %1147 = vmatpush.msrb.mxu3 %v725_v12  ;;  %1187 = vmatpush.msra.mxu1 %v534_v13  ;;  %v541_v12 = vld [vmem:[#allocation8 + $0x358] sm:$0xff] }
 0x132   :  { %1148 = vmatmul.f32.vlgmr.msrb.gmra.mxu3 %v1881_v3  ;;  %1188 = vmatmul.f32.vlgmr.msra.gmra.mxu1 %v1870_v18  ;;  %v1332_v13 = vld [vmem:[#allocation11 + $0x70] sm:$0xff] }
 0x133   :  { %1195 = vmatpush.msra.mxu2 %v702_v63  ;;  %1212 = vmatpush.msra.mxu3 %v816_v14  ;;  %v709_v63 = vld [vmem:[#allocation8 + $0x898] sm:$0xff]  ;;  %v726_v14 = vld [vmem:[#allocation8 + $0x920] sm:$0xff] }
 0x134   :  { %1235 = vmatpush.msrb.mxu0 %v511_v15  ;;  %1252 = vmatpush.msrb.mxu1 %v625_v16  ;;  %v535_v15 = vld [vmem:[#allocation8 + $0x328] sm:$0xff] }
 0x135   :  { %1196 = vmatpush.msra.mxu2 %v696_v17  ;;  %1213 = vmatpush.msra.mxu3 %v810_v5  ;;  %v703_v16 = vld [vmem:[#allocation8 + $0x868] sm:$0xff]  ;;  %v817_v17 = vld [vmem:[#allocation8 + $0xbf8] sm:$0xff] }
 0x136   :  { %1236 = vmatpush.msrb.mxu0 %v505_v19  ;;  %1253 = vmatpush.msrb.mxu1 %v619_v20  ;;  %v697_v5 = vld [vmem:[#allocation8 + $0x838] sm:$0xff]  ;;  %v811_v20 = vld [vmem:[#allocation8 + $0xbc8] sm:$0xff] }
 0x137   :  { %1197 = vmatpush.msra.mxu2 %v690_v21  ;;  %1214 = vmatpush.msra.mxu3 %v804_v22  ;;  %v1349_v19 = vld [vmem:[#allocation11 + $0xf8] sm:$0xff]  ;;  %v1330_v21 = vld [vmem:[#allocation11 + $0x60] sm:$0xff] }
 0x138   :  { %1237 = vmatpush.msrb.mxu0 %v499_v23  ;;  %1254 = vmatpush.msrb.mxu1 %v613_v24  ;;  %v691_v22 = vld [vmem:[#allocation8 + $0x808] sm:$0xff]  ;;  %v1348_v23 = vld [vmem:[#allocation11 + $0xf0] sm:$0xff] }
 0x139   :  { %1198 = vmatpush.msra.mxu2 %v684_v25  ;;  %1215 = vmatpush.msra.mxu3 %v798_v26  ;;  %v805_v24 = vld [vmem:[#allocation8 + $0xb98] sm:$0xff] }
 0x13a   :  { %1238 = vmatpush.msrb.mxu0 %v493_v27  ;;  %1255 = vmatpush.msrb.mxu1 %v607_v28  ;;  %v1329_v25 = vld [vmem:[#allocation11 + $0x58] sm:$0xff]  ;;  %v1347_v27 = vld [vmem:[#allocation11 + $0xe8] sm:$0xff] }
 0x13b   :  { %1199 = vmatpush.msra.mxu2 %v678_v29  ;;  %1216 = vmatpush.msra.mxu3 %v792_v30  ;;  %v685_v26 = vld [vmem:[#allocation8 + $0x7d8] sm:$0xff]  ;;  %v799_v28 = vld [vmem:[#allocation8 + $0xb68] sm:$0xff] }
 0x13c   :  { %1239 = vmatpush.msrb.mxu0 %v487_v31  ;;  %1256 = vmatpush.msrb.mxu1 %v601_v32  ;;  %v1328_v29 = vld [vmem:[#allocation11 + $0x50] sm:$0xff]  ;;  %v1346_v30 = vld [vmem:[#allocation11 + $0xe0] sm:$0xff]  ;;  %v1327_v32 = vld [vmem:[#allocation11 + $0x48] sm:$0xff] }
 0x13d   :  { %1200 = vmatpush.msra.mxu2 %v672_v33  ;;  %1217 = vmatpush.msra.mxu3 %v786_v34  ;;  %v793_v31 = vld [vmem:[#allocation8 + $0xb38] sm:$0xff] }
 0x13e   :  { %1240 = vmatpush.msrb.mxu0 %v481_v35  ;;  %1257 = vmatpush.msrb.mxu1 %v595_v36  ;;  %v673_v33 = vld [vmem:[#allocation8 + $0x778] sm:$0xff]  ;;  %v787_v35 = vld [vmem:[#allocation8 + $0xb08] sm:$0xff] }
 0x13f   :  { %1201 = vmatpush.msra.mxu2 %v666_v37  ;;  %1218 = vmatpush.msra.mxu3 %v780_v38  ;;  %v1345_v34 = vld [vmem:[#allocation11 + $0xd8] sm:$0xff]  ;;  %v1326_v36 = vld [vmem:[#allocation11 + $0x40] sm:$0xff]  ;;  %v1344_v38 = vld [vmem:[#allocation11 + $0xd0] sm:$0xff] }
 0x140   :  { %1241 = vmatpush.msrb.mxu0 %v475_v39  ;;  %1258 = vmatpush.msrb.mxu1 %v589_v40  ;;  %v667_v37 = vld [vmem:[#allocation8 + $0x748] sm:$0xff]  ;;  %v781_v39 = vld [vmem:[#allocation8 + $0xad8] sm:$0xff] }
 0x141   :  { %1202 = vmatpush.msra.mxu2 %v660_v41  ;;  %1219 = vmatpush.msra.mxu3 %v774_v42  ;;  %v1325_v40 = vld [vmem:[#allocation11 + $0x38] sm:$0xff]  ;;  %v1343_v42 = vld [vmem:[#allocation11 + $0xc8] sm:$0xff] }
 0x142   :  { %1242 = vmatpush.msrb.mxu0 %v469_v43  ;;  %1259 = vmatpush.msrb.mxu1 %v583_v44  ;;  %v661_v41 = vld [vmem:[#allocation8 + $0x718] sm:$0xff]  ;;  %v775_v43 = vld [vmem:[#allocation8 + $0xaa8] sm:$0xff] }
 0x143   :  { %1203 = vmatpush.msra.mxu2 %v654_v45  ;;  %1220 = vmatpush.msra.mxu3 %v768_v46  ;;  %v1324_v44 = vld [vmem:[#allocation11 + $0x30] sm:$0xff]  ;;  %v655_v45 = vld [vmem:[#allocation8 + $0x6e8] sm:$0xff] }
 0x144   :  { %1243 = vmatpush.msrb.mxu0 %v463_v47  ;;  %1260 = vmatpush.msrb.mxu1 %v577_v48  ;;  %v1342_v46 = vld [vmem:[#allocation11 + $0xc0] sm:$0xff]  ;;  %v1899_v47 = vld [vmem:[#allocation10] sm:$0x3f]  ;;  %v769_v48 = vld [vmem:[#allocation8 + $0xa78] sm:$0xff] }
 0x145   :  { %1204 = vmatpush.msra.mxu2 %v648_v49  ;;  %1221 = vmatpush.msra.mxu3 %v762_v50  ;;  %v1323_v49 = vld [vmem:[#allocation11 + $0x28] sm:$0xff]  ;;  %v649_v50 = vld [vmem:[#allocation8 + $0x6b8] sm:$0xff] }
 0x146   :  { %1244 = vmatpush.msrb.mxu0 %v457_v51  ;;  %1261 = vmatpush.msrb.mxu1 %v571_v53  ;;  %v1341_v51 = vld [vmem:[#allocation11 + $0xb8] sm:$0xff]  ;;  %v763_v53 = vld [vmem:[#allocation8 + $0xa48] sm:$0xff] }
 0x147   :  { %1205 = vmatpush.msra.mxu2 %v642_v55  ;;  %1222 = vmatpush.msra.mxu3 %v756_v56  ;;  %v1322_v55 = vld [vmem:[#allocation11 + $0x20] sm:$0xff]  ;;  %v820_v56 = vperm.slane %v1899_v47, 0 }
 0x148   :  { %1245 = vmatpush.msrb.mxu0 %v451_v57  ;;  %1262 = vmatpush.msrb.mxu1 %v565_v58  ;;  %v643_v57 = vld [vmem:[#allocation8 + $0x688] sm:$0xff]  ;;  %v1340_v58 = vld [vmem:[#allocation11 + $0xb0] sm:$0xff] }
 0x149   :  { %1206 = vmatpush.msra.mxu2 %v636_v59  ;;  %1223 = vmatpush.msra.mxu3 %v750_v60  ;;  %v757_v59 = vld [vmem:[#allocation8 + $0xa18] sm:$0xff] }
 0x14a   :  { %1246 = vmatpush.msrb.mxu0 %v445_v61  ;;  %1263 = vmatpush.msrb.mxu1 %v559_v62  ;;  %v1321_v60 = vld [vmem:[#allocation11 + $0x18] sm:$0xff]  ;;  %v849_v61 = vpop.f32.mrf.mxu0 }
 0x14b   :  { %1207 = vmatpush.msra.mxu2 %v630_v52  ;;  %1224 = vmatpush.msra.mxu3 %v744_v0  ;;  %v637_v62 = vld [vmem:[#allocation8 + $0x658] sm:$0xff]  ;;  %v1339_v52 = vld [vmem:[#allocation11 + $0xa8] sm:$0xff] }
 0x14c   :  { %1247 = vmatpush.msrb.mxu0 %v439_v1  ;;  %1264 = vmatpush.msrb.mxu1 %v553_v2  ;;  %v751_v0 = vld [vmem:[#allocation8 + $0x9e8] sm:$0xff]  ;;  %v1320_v1 = vld [vmem:[#allocation11 + $0x10] sm:$0xff]  ;;  %v850_v2 = vadd.f32 %v849_v61, %v820_v56 }
 0x14d   :  { %1208 = vmatmul.f32.vlgmr.msra.gmra.mxu2 %v1877_v54  ;;  %1248 = vmatmul.f32.vlgmr.msrb.gmra.mxu0 %v1867_v8  ;;  %v1331_v8 = vld [vmem:[#allocation11 + $0x68] sm:$0xff]  ;;  %v1374_v56 = vld [vmem:[#allocation11 + $0x1c0] sm:$0xff] }
 0x14e   :  { %1272 = vmatpush.msrb.mxu2 %v721_v4  ;;  %1225 = vmatpush.msra.mxu3 %v738_v6  ;;  %v869_v4 = vpop.f32.mrf.mxu1  ;;  %v631_v6 = vld [vmem:[#allocation8 + $0x628] sm:$0xff] }
 0x14f   :  { %1265 = vmatpush.msrb.mxu1 %v547_v7  ;;  %1418 = vmatpush.msra.mxu0 %v1333_v9  ;;  %v1338_v7 = vld [vmem:[#allocation11 + $0xa0] sm:$0xff]  ;;  %v745_v9 = vld [vmem:[#allocation8 + $0x9b8] sm:$0xff] }
 0x150   :  { %1273 = vmatpush.msrb.mxu2 %v715_v10  ;;  %1226 = vmatpush.msra.mxu3 %v732_v11  ;;  %v1319_v11 = vld [vmem:[#allocation11 + $0x8] sm:$0xff] }
 0x151   :  { %1266 = vmatpush.msrb.mxu1 %v541_v12  ;;  %1419 = vmatpush.msra.mxu0 %v1332_v13  ;;  %v1365_v12 = vld [vmem:[#allocation11 + $0x178] sm:$0xff]  ;;  %v739_v13 = vld [vmem:[#allocation8 + $0x988] sm:$0xff] }
 0x152   :  { %1274 = vmatpush.msrb.mxu2 %v709_v63  ;;  %1227 = vmatpush.msra.mxu3 %v726_v14  ;;  %v1337_v63 = vld [vmem:[#allocation11 + $0x98] sm:$0xff]  ;;  %v870_v14 = vadd.f32 %v869_v4, %v850_v2  ;;  %v1370_v2 = vld [vmem:[#allocation11 + $0x1a0] sm:$0xff] }
 0x153   :  { %1267 = vmatpush.msrb.mxu1 %v535_v15  ;;  %1228 = vmatmul.f32.vlgmr.msra.gmra.mxu3 %v1881_v3  ;;  %v1318_v15 = vld [vmem:[#allocation11] sm:$0xff] }
 0x154   :  { %1268 = vmatmul.f32.vlgmr.msrb.gmra.mxu1 %v1870_v18  ;;  %1275 = vmatpush.msrb.mxu2 %v703_v16  ;;  %v679_v18 = vld [vmem:[#allocation8 + $0x7a8] sm:$0xff]  ;;  %v1364_v16 = vld [vmem:[#allocation11 + $0x170] sm:$0xff] }
 0x155   :  { %1292 = vmatpush.msrb.mxu3 %v817_v17  ;;  %1420 = vmatpush.msra.mxu0 %v1331_v8  ;;  %v821_v17 = vperm.slane %v1899_v47, 1  ;;  %v733_v8 = vld [vmem:[#allocation8 + $0x958] sm:$0xff] }
 0x156   :  { %1276 = vmatpush.msrb.mxu2 %v697_v5  ;;  %1438 = vmatpush.msra.mxu1 %v1349_v19  ;;  %v1336_v5 = vld [vmem:[#allocation11 + $0x90] sm:$0xff] }
 0x157   :  { %1293 = vmatpush.msrb.mxu3 %v811_v20  ;;  %1421 = vmatpush.msra.mxu0 %v1330_v21  ;;  %v1363_v20 = vld [vmem:[#allocation11 + $0x168] sm:$0xff] }
 0x158   :  { %1277 = vmatpush.msrb.mxu2 %v691_v22  ;;  %1439 = vmatpush.msra.mxu1 %v1348_v23  ;;  %v727_v21 = vld [vmem:[#allocation8 + $0x928] sm:$0xff] }
 0x159   :  { %1294 = vmatpush.msrb.mxu3 %v805_v24  ;;  %1422 = vmatpush.msra.mxu0 %v1329_v25  ;;  %v1335_v23 = vld [vmem:[#allocation11 + $0x88] sm:$0xff]  ;;  %v929_v24 = vpop.f32.mrf.mxu0  ;;  %v1362_v25 = vld [vmem:[#allocation11 + $0x160] sm:$0xff] }
 0x15a   :  { %1278 = vmatpush.msrb.mxu2 %v685_v26  ;;  %1440 = vmatpush.msra.mxu1 %v1347_v27  ;;  %v930_v26 = vadd.f32 %v929_v24, %v821_v17  ;;  %v1334_v27 = vld [vmem:[#allocation11 + $0x80] sm:$0xff]  ;;  %v1393_v17 = vld [vmem:[#allocation11 + $0x258] sm:$0xff] }
 0x15b   :  { %1295 = vmatpush.msrb.mxu3 %v799_v28  ;;  %1423 = vmatpush.msra.mxu0 %v1328_v29  ;;  %v949_v28 = vpop.f32.mrf.mxu1 }
 0x15c   :  { %1279 = vmatpush.msrb.mxu2 %v679_v18  ;;  %1441 = vmatpush.msra.mxu1 %v1346_v30  ;;  %v1361_v18 = vld [vmem:[#allocation11 + $0x158] sm:$0xff] }
 0x15d   :  { %1296 = vmatpush.msrb.mxu3 %v793_v31  ;;  %1424 = vmatpush.msra.mxu0 %v1327_v32  ;;  %v1360_v31 = vld [vmem:[#allocation11 + $0x150] sm:$0xff]  ;;  %v950_v32 = vadd.f32 %v949_v28, %v930_v26  ;;  %v1387_v26 = vld [vmem:[#allocation11 + $0x228] sm:$0xff]  ;;  %v1386_v28 = vld [vmem:[#allocation11 + $0x220] sm:$0xff] }
 0x15e   :  { %1280 = vmatpush.msrb.mxu2 %v673_v33  ;;  %1442 = vmatpush.msra.mxu1 %v1345_v34  ;;  %v1359_v33 = vld [vmem:[#allocation11 + $0x148] sm:$0xff] }
 0x15f   :  { %1297 = vmatpush.msrb.mxu3 %v787_v35  ;;  %1425 = vmatpush.msra.mxu0 %v1326_v36  ;;  %v1381_v35 = vld [vmem:[#allocation11 + $0x1f8] sm:$0xff]  ;;  %v1380_v36 = vld [vmem:[#allocation11 + $0x1f0] sm:$0xff] }
 0x160   :  { %1281 = vmatpush.msrb.mxu2 %v667_v37  ;;  %1443 = vmatpush.msra.mxu1 %v1344_v38  ;;  %v1358_v38 = vld [vmem:[#allocation11 + $0x140] sm:$0xff] }
 0x161   :  { %1298 = vmatpush.msrb.mxu3 %v781_v39  ;;  %1426 = vmatpush.msra.mxu0 %v1325_v40  ;;  %v1379_v40 = vld [vmem:[#allocation11 + $0x1e8] sm:$0xff] }
 0x162   :  { %1282 = vmatpush.msrb.mxu2 %v661_v41  ;;  %1444 = vmatpush.msra.mxu1 %v1343_v42  ;;  %v1357_v41 = vld [vmem:[#allocation11 + $0x138] sm:$0xff]  ;;  %v1378_v42 = vld [vmem:[#allocation11 + $0x1e0] sm:$0xff] }
 0x163   :  { %1299 = vmatpush.msrb.mxu3 %v775_v43  ;;  %1427 = vmatpush.msra.mxu0 %v1324_v44  ;;  %v1356_v43 = vld [vmem:[#allocation11 + $0x130] sm:$0xff]  ;;  %v1377_v44 = vld [vmem:[#allocation11 + $0x1d8] sm:$0xff] }
 0x164   :  { %1283 = vmatpush.msrb.mxu2 %v655_v45  ;;  %1445 = vmatpush.msra.mxu1 %v1342_v46  ;;  %v1355_v45 = vld [vmem:[#allocation11 + $0x128] sm:$0xff]  ;;  %v1376_v46 = vld [vmem:[#allocation11 + $0x1d0] sm:$0xff] }
 0x165   :  { %1300 = vmatpush.msrb.mxu3 %v769_v48  ;;  %1428 = vmatpush.msra.mxu0 %v1323_v49  ;;  %v1354_v48 = vld [vmem:[#allocation11 + $0x120] sm:$0xff]  ;;  %v1375_v49 = vld [vmem:[#allocation11 + $0x1c8] sm:$0xff] }
 0x166   :  { %1284 = vmatpush.msrb.mxu2 %v649_v50  ;;  %1446 = vmatpush.msra.mxu1 %v1341_v51  ;;  %v1353_v50 = vld [vmem:[#allocation11 + $0x118] sm:$0xff]  ;;  %v1352_v51 = vld [vmem:[#allocation11 + $0x110] sm:$0xff] }
 0x167   :  { %1301 = vmatpush.msrb.mxu3 %v763_v53  ;;  %1429 = vmatpush.msra.mxu0 %v1322_v55  ;;  %v1351_v53 = vld [vmem:[#allocation11 + $0x108] sm:$0xff]  ;;  %v1350_v55 = vld [vmem:[#allocation11 + $0x100] sm:$0xff] }
 0x168   :  { %1285 = vmatpush.msrb.mxu2 %v643_v57  ;;  %1447 = vmatpush.msra.mxu1 %v1340_v58  ;;  %v1373_v57 = vld [vmem:[#allocation11 + $0x1b8] sm:$0xff]  ;;  %v822_v58 = vperm.slane %v1899_v47, 2 }
 0x169   :  { %1302 = vmatpush.msrb.mxu3 %v757_v59  ;;  %1430 = vmatpush.msra.mxu0 %v1321_v60  ;;  %v1009_v59 = vpop.f32.mrf.mxu0  ;;  %v1372_v60 = vld [vmem:[#allocation11 + $0x1b0] sm:$0xff] }
 0x16a   :  { %1286 = vmatpush.msrb.mxu2 %v637_v62  ;;  %1448 = vmatpush.msra.mxu1 %v1339_v52  ;;  %v889_v10 = vpop.f32.mrf.mxu2  ;;  %v1029_v61 = vpop.f32.mrf.mxu1  ;;  %v1010_v62 = vadd.f32 %v1009_v59, %v822_v58  ;;  %v1400_v59 = vld [vmem:[#allocation11 + $0x290] sm:$0xff] }
 0x16b   :  { %1303 = vmatpush.msrb.mxu3 %v751_v0  ;;  %1431 = vmatpush.msra.mxu0 %v1320_v1  ;;  %v890_v19 = vadd.f32 %v889_v10, %v870_v14  ;;  %v1371_v1 = vld [vmem:[#allocation11 + $0x1a8] sm:$0xff]  ;;  %v1396_v14 = vld [vmem:[#allocation11 + $0x270] sm:$0xff] }
 0x16c   :  { %1287 = vmatpush.msrb.mxu2 %v631_v6  ;;  %1449 = vmatpush.msra.mxu1 %v1338_v7  ;;  %v1030_v0 = vadd.f32 %v1029_v61, %v1010_v62  ;;  %v1369_v6 = vld [vmem:[#allocation11 + $0x198] sm:$0xff]  ;;  %v1399_v61 = vld [vmem:[#allocation11 + $0x288] sm:$0xff] }
 0x16d   :  { %1304 = vmatpush.msrb.mxu3 %v745_v9  ;;  %1288 = vmatmul.f32.vlgmr.msrb.gmra.mxu2 %v1877_v54 }
 0x16e   :  { %1432 = vmatpush.msra.mxu0 %v1319_v11  ;;  %1458 = vmatpush.msra.mxu2 %v1365_v12  ;;  %v1368_v11 = vld [vmem:[#allocation11 + $0x190] sm:$0xff]  ;;  %v1367_v12 = vld [vmem:[#allocation11 + $0x188] sm:$0xff] }
 0x16f   :  { %1305 = vmatpush.msrb.mxu3 %v739_v13  ;;  %1450 = vmatpush.msra.mxu1 %v1337_v63  ;;  %v1366_v13 = vld [vmem:[#allocation11 + $0x180] sm:$0xff]  ;;  %v1397_v63 = vld [vmem:[#allocation11 + $0x278] sm:$0xff] }
 0x170   :  { %v909_v22 = vpop.f32.mrf.mxu3  ;;  %1433 = vmatpush.msra.mxu0 %v1318_v15  ;;  %1459 = vmatpush.msra.mxu2 %v1364_v16  ;;  %v1395_v15 = vld [vmem:[#allocation11 + $0x268] sm:$0xff]  ;;  %v1394_v16 = vld [vmem:[#allocation11 + $0x260] sm:$0xff] }
 0x171   :  { %1306 = vmatpush.msrb.mxu3 %v733_v8  ;;  %v910_v54 = vadd.f32 %v909_v22, %v890_v19  ;;  %1451 = vmatpush.msra.mxu1 %v1336_v5  ;;  %v1392_v8 = vld [vmem:[#allocation11 + $0x250] sm:$0xff]  ;;  %v1391_v5 = vld [vmem:[#allocation11 + $0x248] sm:$0xff]  ;;  %v1390_v19 = vld [vmem:[#allocation11 + $0x240] sm:$0xff] }
 0x172   :  { %1460 = vmatpush.msra.mxu2 %v1363_v20  ;;  %1498 = vmatpush.msrb.mxu0 %v1397_v63  ;;  %v1389_v20 = vld [vmem:[#allocation11 + $0x238] sm:$0xff] }
 0x173   :  { %1307 = vmatpush.msrb.mxu3 %v727_v21  ;;  %v1312_v29 = vmax.f32 %v910_v54, 0.0  ;;  %1452 = vmatpush.msra.mxu1 %v1335_v23  ;;  %v969_v30 = vpop.f32.mrf.mxu2  ;;  %v823_v21 = vperm.slane %v1899_v47, 3  ;;  %v1388_v23 = vld [vmem:[#allocation11 + $0x230] sm:$0xff] }
 0x174   :  { %1308 = vmatmul.f32.vlgmr.msrb.gmra.mxu3 %v1881_v3  ;;  %1461 = vmatpush.msra.mxu2 %v1362_v25  ;;  %v970_v34 = vadd.f32 %v969_v30, %v950_v32  ;;  %v1384_v32 = vld [vmem:[#allocation11 + $0x210] sm:$0xff] }
 0x175   :  { %1434 = vmatmul.f32.vlgmr.msra.gmra.mxu0 %v1312_v29  ;;  %1453 = vmatpush.msra.mxu1 %v1334_v27  ;;  %v1385_v29 = vld [vmem:[#allocation11 + $0x218] sm:$0xff] }
 0x176   :  { %1462 = vmatpush.msra.mxu2 %v1361_v18  ;;  %1478 = vmatpush.msra.mxu3 %v1381_v35  ;;  %v1382_v35 = vld [vmem:[#allocation11 + $0x200] sm:$0xff] }
 0x177   :  { %1499 = vmatpush.msrb.mxu0 %v1396_v14 }
 0x178   :  { %1463 = vmatpush.msra.mxu2 %v1360_v31  ;;  %1479 = vmatpush.msra.mxu3 %v1380_v36  ;;  %v1413_v36 = vld [vmem:[#allocation11 + $0x2f8] sm:$0xff] }
 0x179   :  { %v989_v37 = vpop.f32.mrf.mxu3  ;;  %1500 = vmatpush.msrb.mxu0 %v1395_v15  ;;  %1518 = vmatpush.msrb.mxu1 %v1413_v36 }
 0x17a   :  { %v990_v39 = vadd.f32 %v989_v37, %v970_v34  ;;  %1464 = vmatpush.msra.mxu2 %v1359_v33  ;;  %1480 = vmatpush.msra.mxu3 %v1379_v40  ;;  %v1383_v34 = vld [vmem:[#allocation11 + $0x208] sm:$0xff]  ;;  %v1412_v37 = vld [vmem:[#allocation11 + $0x2f0] sm:$0xff]  ;;  %v1409_v40 = vld [vmem:[#allocation11 + $0x2d8] sm:$0xff] }
 0x17b   :  { %1501 = vmatpush.msrb.mxu0 %v1394_v16  ;;  %1519 = vmatpush.msrb.mxu1 %v1412_v37 }
 0x17c   :  { %v1313_v3 = vmax.f32 %v990_v39, 0.0  ;;  %1465 = vmatpush.msra.mxu2 %v1358_v38  ;;  %1481 = vmatpush.msra.mxu3 %v1378_v42  ;;  %v1411_v38 = vld [vmem:[#allocation11 + $0x2e8] sm:$0xff]  ;;  %v1410_v39 = vld [vmem:[#allocation11 + $0x2e0] sm:$0xff] }
 0x17d   :  { %1502 = vmatpush.msrb.mxu0 %v1393_v17  ;;  %1520 = vmatpush.msrb.mxu1 %v1411_v38  ;;  %v1406_v42 = vld [vmem:[#allocation11 + $0x2c0] sm:$0xff] }
 0x17e   :  { %1454 = vmatmul.f32.vlgmr.msra.gmra.mxu1 %v1313_v3  ;;  %1466 = vmatpush.msra.mxu2 %v1357_v41  ;;  %v1408_v41 = vld [vmem:[#allocation11 + $0x2d0] sm:$0xff]  ;;  %v1407_v3 = vld [vmem:[#allocation11 + $0x2c8] sm:$0xff] }
 0x17f   :  { %1482 = vmatpush.msra.mxu3 %v1377_v44  ;;  %1503 = vmatpush.msrb.mxu0 %v1392_v8  ;;  %v1404_v44 = vld [vmem:[#allocation11 + $0x2b0] sm:$0xff] }
 0x180   :  { %1467 = vmatpush.msra.mxu2 %v1356_v43  ;;  %1521 = vmatpush.msrb.mxu1 %v1410_v39  ;;  %v1405_v43 = vld [vmem:[#allocation11 + $0x2b8] sm:$0xff] }
 0x181   :  { %1483 = vmatpush.msra.mxu3 %v1376_v46  ;;  %1504 = vmatpush.msrb.mxu0 %v1391_v5 }
 0x182   :  { %1468 = vmatpush.msra.mxu2 %v1355_v45  ;;  %1522 = vmatpush.msrb.mxu1 %v1409_v40  ;;  %v824_v45 = vperm.slane %v1899_v47, 4 }
 0x183   :  { %1484 = vmatpush.msra.mxu3 %v1375_v49  ;;  %1505 = vmatpush.msrb.mxu0 %v1390_v19  ;;  %v1403_v49 = vld [vmem:[#allocation11 + $0x2a8] sm:$0xff] }
 0x184   :  { %1469 = vmatpush.msra.mxu2 %v1354_v48  ;;  %1523 = vmatpush.msrb.mxu1 %v1408_v41 }
 0x185   :  { %1485 = vmatpush.msra.mxu3 %v1374_v56  ;;  %1506 = vmatpush.msrb.mxu0 %v1389_v20 }
 0x186   :  { %1470 = vmatpush.msra.mxu2 %v1353_v50  ;;  %v1089_v22 = vpop.f32.mrf.mxu0  ;;  %1524 = vmatpush.msrb.mxu1 %v1407_v3 }
 0x187   :  { %1486 = vmatpush.msra.mxu3 %v1373_v57  ;;  %v1090_v54 = vadd.f32 %v1089_v22, %v823_v21  ;;  %1507 = vmatpush.msrb.mxu0 %v1388_v23 }
 0x188   :  { %1471 = vmatpush.msra.mxu2 %v1352_v51  ;;  %1525 = vmatpush.msrb.mxu1 %v1406_v42  ;;  %v1402_v51 = vld [vmem:[#allocation11 + $0x2a0] sm:$0xff] }
 0x189   :  { %1487 = vmatpush.msra.mxu3 %v1372_v60  ;;  %1508 = vmatpush.msrb.mxu0 %v1387_v26 }
 0x18a   :  { %1472 = vmatpush.msra.mxu2 %v1351_v53  ;;  %1526 = vmatpush.msrb.mxu1 %v1405_v43 }
 0x18b   :  { %1488 = vmatpush.msra.mxu3 %v1371_v1  ;;  %1509 = vmatpush.msrb.mxu0 %v1386_v28 }
 0x18c   :  { %1473 = vmatpush.msra.mxu2 %v1350_v55  ;;  %v1049_v52 = vpop.f32.mrf.mxu2  ;;  %1527 = vmatpush.msrb.mxu1 %v1404_v44  ;;  %v1401_v55 = vld [vmem:[#allocation11 + $0x298] sm:$0xff] }
 0x18d   :  { %v1050_v4 = vadd.f32 %v1049_v52, %v1030_v0  ;;  %1489 = vmatpush.msra.mxu3 %v1370_v2  ;;  %v1109_v24 = vpop.f32.mrf.mxu1  ;;  %1510 = vmatpush.msrb.mxu0 %v1385_v29  ;;  %v1398_v52 = vld [vmem:[#allocation11 + $0x280] sm:$0xff]  ;;  %v825_v0 = vperm.slane %v1899_v47, 5 }
 0x18e   :  { %v1110_v27 = vadd.f32 %v1109_v24, %v1090_v54  ;;  %1528 = vmatpush.msrb.mxu1 %v1403_v49 }
 0x18f   :  { %1490 = vmatpush.msra.mxu3 %v1369_v6  ;;  %1511 = vmatpush.msrb.mxu0 %v1384_v32 }
 0x190   :  { %1529 = vmatpush.msrb.mxu1 %v1402_v51 }
 0x191   :  { %1491 = vmatpush.msra.mxu3 %v1368_v11  ;;  %1512 = vmatpush.msrb.mxu0 %v1383_v34 }
 0x192   :  { %1530 = vmatpush.msrb.mxu1 %v1401_v55 }
 0x193   :  { %v1069_v7 = vpop.f32.mrf.mxu3  ;;  %1492 = vmatpush.msra.mxu3 %v1367_v12  ;;  %1513 = vmatpush.msrb.mxu0 %v1382_v35 }
 0x194   :  { %v1070_v9 = vadd.f32 %v1069_v7, %v1050_v4  ;;  %1531 = vmatpush.msrb.mxu1 %v1400_v59 }
 0x195   :  { %1493 = vmatpush.msra.mxu3 %v1366_v13  ;;  %v1573_v13 = vld [vmem:[#allocation13] ss:$0 sm:$0xff] }
 0x196   :  { %v1314_v10 = vmax.f32 %v1070_v9, 0.0  ;;  %1532 = vmatpush.msrb.mxu1 %v1399_v61 }
 0x198   :  { %1474 = vmatmul.f32.vlgmr.msra.gmra.mxu2 %v1314_v10  ;;  %1533 = vmatpush.msrb.mxu1 %v1398_v52 }
 0x1a8   :  { %v1169_v46 = vpop.f32.mrf.mxu0 }
 0x1a9   :  { %v1170_v50 = vadd.f32 %v1169_v46, %v824_v45 }
 0x1ae   :  { %v1129_v25 = vpop.f32.mrf.mxu2 }
 0x1af   :  { %v1130_v18 = vadd.f32 %v1129_v25, %v1110_v27  ;;  %v1189_v48 = vpop.f32.mrf.mxu1 }
 0x1b0   :  { %v1190_v56 = vadd.f32 %v1189_v48, %v1170_v50 }
 0x1b5   :  { %v1149_v30 = vpop.f32.mrf.mxu3 }
 0x1b6   :  { %v1150_v31 = vadd.f32 %v1149_v30, %v1130_v18 }
 0x1b8   :  { %v1315_v33 = vmax.f32 %v1150_v31, 0.0 }
 0x1ba   :  { %1494 = vmatmul.f32.vlgmr.msra.gmra.mxu3 %v1315_v33 }
 0x1ca   :  { %v1249_v1 = vpop.f32.mrf.mxu0 }
 0x1cb   :  { %v1250_v4 = vadd.f32 %v1249_v1, %v825_v0 }
 0x1d0   :  { %v1209_v53 = vpop.f32.mrf.mxu2 }
 0x1d1   :  { %v1210_v57 = vadd.f32 %v1209_v53, %v1190_v56  ;;  %v1269_v2 = vpop.f32.mrf.mxu1 }
 0x1d2   :  { %v1270_v7 = vadd.f32 %v1269_v2, %v1250_v4 }
 0x1d6   :  { %v1229_v58 = vpop.f32.mrf.mxu3 }
 0x1d7   :  { %v1230_v60 = vadd.f32 %v1229_v58, %v1210_v57 }
 0x1d9   :  { %v1316_v62 = vmax.f32 %v1230_v60, 0.0 }
 0x1db   :  { %1514 = vmatmul.f32.vlgmr.msrb.gmra.mxu0 %v1316_v62 }
 0x1f0   :  { %v1289_v6 = vpop.f32.mrf.mxu2 }
 0x1f1   :  { %v1290_v9 = vadd.f32 %v1289_v6, %v1270_v7 }
 0x1f2   :  { %v1435_v63 = vpop.f32.mrf.mxu0 }
 0x1f3   :  { %v1436_v15 = vadd.f32 %v1573_v13, %v1435_v63 }
 0x1f7   :  { %v1309_v10 = vpop.f32.mrf.mxu3 }
 0x1f8   :  { %v1310_v11 = vadd.f32 %v1309_v10, %v1290_v9 }
 0x1fa   :  { %v1317_v12 = vmax.f32 %v1310_v11, 0.0 }
 0x1fb   :  { %v1455_v14 = vpop.f32.mrf.mxu1 }
 0x1fc   :  { %1534 = vmatmul.f32.vlgmr.msrb.gmra.mxu1 %v1317_v12  ;;  %v1456_v17 = vadd.f32 %v1455_v14, %v1436_v15 }
 0x21b   :  { %v1475_v16 = vpop.f32.mrf.mxu2 }
 0x21c   :  { %v1476_v5 = vadd.f32 %v1475_v16, %v1456_v17 }
 0x23d   :  { %v1495_v8 = vpop.f32.mrf.mxu3 }
 0x23e   :  { %v1496_v47 = vadd.f32 %v1495_v8, %v1476_v5 }
 0x258   :  { %v1515_v19 = vpop.f32.mrf.mxu0 }
 0x259   :  { %v1516_v20 = vadd.f32 %v1515_v19, %v1496_v47 }
 0x279   :  { %v1535_v21 = vpop.f32.mrf.mxu1 }
 0x27a   :  { %v1536_v22 = vadd.f32 %v1535_v21, %v1516_v20 }
 0x27c   :  { %1538 = vst [vmem:[#allocation14] sm:$0xff] %v1536_v22 }
 0x27d   :  { %1549 = dma.vmem_to_hbm [thread:$0]  %s1545_s6, 128, %s1547_s15, [#allocation4]  }
 0x27e   :  { %1774 = dma.done.wait [#allocation4], 128  }
 0x27f   :  { %1775 = vsyncadd [#allocation4], 4294967168 }
 0x280   :  { %1554 = vsyncpa [#allocation3], 1 }
 0x281   :  { %1555 = vsyncpa [#allocation6], 1 }
 0x282   :  { %1556 = vsyncpa [#allocation9], 1 }
 0x283   :  { %1557 = vsyncpa [#allocation12], 1 }
 0x284   :  { %1558 = vsyncpa [#allocation4], 1 }

</bundles_post_ra>
